<compile_context>
chip_gen: v6e
topology: v6e:2x2x1
jax: 0.10.0
libtpu: 0.0.40
codegen_flags: <defaults>
</compile_context>

<pallas_src>
import jax
import jax.numpy as jnp
from jax import lax
from jax.experimental import pallas as pl
from jax.experimental.pallas import tpu as pltpu

BN_EPS = 1e-5
FEAT_C = 2048
HID1 = 256
HID2 = 164
HID2_PAD = 256   # pad 164 -> 256 lanes (2 full 128-lane vregs)


# ----------------------------------------------------------------------------
# Deterministic parameter construction
# ----------------------------------------------------------------------------
class KeyGen:
    def __init__(self, key):
        self.key = key

    def __call__(self):
        self.key, sub = jax.random.split(self.key)
        return sub


def conv_params(kg, kh, kw, cin, cout):
    fan_in = kh * kw * cin
    return jax.random.normal(kg(), (kh, kw, cin, cout), jnp.float32) * (2.0 / fan_in) ** 0.5


def bn_params(c):
    # (gamma, beta, running_mean, running_var) -- PyTorch default init
    return (jnp.ones((c,), jnp.float32), jnp.zeros((c,), jnp.float32),
            jnp.zeros((c,), jnp.float32), jnp.ones((c,), jnp.float32))


def linear_params(kg, fin, fout):
    bound = 1.0 / (fin ** 0.5)
    w = jax.random.uniform(kg(), (fin, fout), jnp.float32, -bound, bound)
    b = jax.random.uniform(kg(), (fout,), jnp.float32, -bound, bound)
    return w, b


# ----------------------------------------------------------------------------
# ResNet50 backbone (plain JAX glue; eval-mode BN, fc = Identity)
# TODO(synk): backbone convs / maxpool use lax.conv_general_dilated / reduce_window
#             (plain XLA, bf16 compute with f32 accumulation), not hand-written
#             Pallas convolutions.
# ----------------------------------------------------------------------------
def conv2d(x, w, stride, pad):
    return lax.conv_general_dilated(
        x.astype(jnp.bfloat16), w.astype(jnp.bfloat16),
        window_strides=(stride, stride),
        padding=((pad, pad), (pad, pad)),
        dimension_numbers=("NHWC", "HWIO", "NHWC"),
        preferred_element_type=jnp.float32)


def bn_eval(x, p):
    gamma, beta, mean, var = p
    return (x - mean) * (gamma / jnp.sqrt(var + BN_EPS)) + beta


def make_bottleneck(kg, cin, planes, stride):
    p = {
        "w1": conv_params(kg, 1, 1, cin, planes), "bn1": bn_params(planes),
        "w2": conv_params(kg, 3, 3, planes, planes), "bn2": bn_params(planes),
        "w3": conv_params(kg, 1, 1, planes, planes * 4), "bn3": bn_params(planes * 4),
        "stride": stride,
    }
    if stride != 1 or cin != planes * 4:
        p["wd"] = conv_params(kg, 1, 1, cin, planes * 4)
        p["bnd"] = bn_params(planes * 4)
    return p


def bottleneck(x, p):
    out = jax.nn.relu(bn_eval(conv2d(x, p["w1"], 1, 0), p["bn1"]))
    out = jax.nn.relu(bn_eval(conv2d(out, p["w2"], p["stride"], 1), p["bn2"]))
    out = bn_eval(conv2d(out, p["w3"], 1, 0), p["bn3"])
    if "wd" in p:
        sc = bn_eval(conv2d(x, p["wd"], p["stride"], 0), p["bnd"])
    else:
        sc = x
    return jax.nn.relu(out + sc)


def make_resnet50(kg):
    params = {"conv1": conv_params(kg, 7, 7, 3, 64), "bn1": bn_params(64), "layers": []}
    cfg = [(64, 3, 1), (128, 4, 2), (256, 6, 2), (512, 3, 2)]
    cin = 64
    for planes, nblocks, stride in cfg:
        blocks = []
        for b in range(nblocks):
            blocks.append(make_bottleneck(kg, cin, planes, stride if b == 0 else 1))
            cin = planes * 4
        params["layers"].append(blocks)
    return params


def resnet50_features(x_nchw, params):
    x = jnp.transpose(x_nchw, (0, 2, 3, 1))                 # NCHW -> NHWC
    x = jax.nn.relu(bn_eval(conv2d(x, params["conv1"], 2, 3), params["bn1"]))
    x = lax.reduce_window(x, jnp.float32(-jnp.inf), lax.max,
                          (1, 3, 3, 1), (1, 2, 2, 1),
                          ((0, 0), (1, 1), (1, 1), (0, 0)))  # maxpool 3x3 s2 p1
    for blocks in params["layers"]:
        for p in blocks:
            x = bottleneck(x, p)
    B, H, W, C = x.shape
    return x.reshape(B, H * W, C)                            # (B, S, 2048); avg pool done in kernel


# ----------------------------------------------------------------------------
# Pallas fused head kernel: avgpool + fc1(+bn1 folded)/relu + fc2(+bn2 folded)/relu
#                           + fc3 + sigmoid
# ----------------------------------------------------------------------------
def head_kernel(feat_ref, w1_ref, t1_ref, w2_ref, t2_ref, w3t_ref, b3_ref, out_ref):
    # Global average pool over the spatial axis; accumulate in f32 (feat is bf16).
    inv_s = 1.0 / feat_ref.shape[1]                                            # static Python const
    pooled = jnp.sum(feat_ref[...].astype(jnp.float32), axis=1) * inv_s        # (TB, 2048) f32

    # fc1 (BN scale folded into weights): bf16 MXU path, f32 accumulator.
    h = jnp.dot(pooled.astype(jnp.bfloat16), w1_ref[...],
                preferred_element_type=jnp.float32)                            # (TB, 256)
    h = jnp.maximum(h + t1_ref[...], 0.0)                                      # relu (dropout = id)

    # fc2 (BN scale folded, zero-padded 164 -> 256 lanes): bf16 MXU path + relu.
    h = jnp.dot(h.astype(jnp.bfloat16), w2_ref[...],
                preferred_element_type=jnp.float32)                            # (TB, 256)
    h = jnp.maximum(h + t2_ref[...], 0.0)

    # fc3 (out_features=1) as a lane reduction (padded lanes are exact zeros), then sigmoid.
    h3 = jnp.sum(h * w3t_ref[...], axis=-1, keepdims=True) + b3_ref[...]       # (TB, 1)
    sig = pl.reciprocal(1.0 + jnp.exp(-h3), approx=True)                       # EUP exp + EUP recip
    out_ref[...] = jnp.clip(sig, 0.0, 1.0)                                     # guard approx recip


def _choose_batch_tile(B, S):
    # Keep the double-buffered bf16 feat tile around ~24 MiB so it fits v7x's
    # 64 MiB VMEM (and the explicit 40 MiB scoped limit) with headroom.
    budget = 24 * 1024 * 1024
    per_row = S * FEAT_C * 2                      # bf16 bytes per batch row
    cap = max(8, min(256, budget // (2 * per_row)))
    cap = (cap // 8) * 8                          # keep the (TB, 1) output block sublane-legal
    b_pad = ((B + 7) // 8) * 8
    return int(max(8, min(cap, b_pad)))


def monkeypox_head(feat, w1, t1, w2, t2, w3t, b3):
    B, S, C = feat.shape
    tb = _choose_batch_tile(B, S)
    nb = pl.cdiv(B, tb)
    b_pad = nb * tb

    feat_bf16 = feat.astype(jnp.bfloat16)
    if b_pad != B:
        feat_bf16 = jnp.pad(feat_bf16, ((0, b_pad - B), (0, 0), (0, 0)))

    out = pl.pallas_call(
        head_kernel,
        out_shape=jax.ShapeDtypeStruct((b_pad, 1), jnp.float32),
        grid_spec=pltpu.PrefetchScalarGridSpec(
            num_scalar_prefetch=0,
            grid=(nb,),
            in_specs=[
                pl.BlockSpec((tb, S, C), lambda b: (b, 0, 0)),        # feat tile (bf16)
                pl.BlockSpec((C, HID1), lambda b: (0, 0)),            # w1 (bf16, BN folded)
                pl.BlockSpec((1, HID1), lambda b: (0, 0)),            # t1 shift (f32)
                pl.BlockSpec((HID1, HID2_PAD), lambda b: (0, 0)),     # w2 (bf16, padded, BN folded)
                pl.BlockSpec((1, HID2_PAD), lambda b: (0, 0)),        # t2 shift (f32, padded)
                pl.BlockSpec((1, HID2_PAD), lambda b: (0, 0)),        # w3^T (f32, padded)
                pl.BlockSpec((1, 1), lambda b: (0, 0)),               # b3
            ],
            out_specs=pl.BlockSpec((tb, 1), lambda b: (b, 0)),
        ),
        compiler_params=pltpu.CompilerParams(
            dimension_semantics=("parallel",),          # v7x: shard batch over 2 TCs
            vmem_limit_bytes=40 * 1024 * 1024,          # explicit, below v7x 64 MiB physical
        ),
    )(feat_bf16, w1, t1, w2, t2, w3t, b3)
    return out[:B]


def fold_linear_bn(bias, bn_p):
    # y = BN(xW + b) = (xW) * scale + shift   (eval mode)
    gamma, beta, mean, var = bn_p
    scale = gamma / jnp.sqrt(var + BN_EPS)
    shift = beta + (bias - mean) * scale
    return scale[None, :], shift[None, :]


def make_head(kg):
    w1, b1 = linear_params(kg, FEAT_C, HID1)
    bn1 = bn_params(HID1)
    w2, b2 = linear_params(kg, HID1, HID2)
    bn2 = bn_params(HID2)
    w3, b3 = linear_params(kg, HID2, 1)

    s1, t1 = fold_linear_bn(b1, bn1)          # (1,256), (1,256)
    s2, t2 = fold_linear_bn(b2, bn2)          # (1,164), (1,164)

    # Fold BN scales into the weights so the matmuls absorb them for free.
    w1f = (w1 * s1).astype(jnp.bfloat16)      # (2048, 256) bf16 for the MXU
    w2f = w2 * s2                             # (256, 164) f32

    # Zero-pad the 164-wide hidden layer to 256 lanes (full 128-lane vregs);
    # padded weight / shift / fc3 lanes are exact zeros so relu + fc3 ignore them.
    w2p = (jnp.zeros((HID1, HID2_PAD), jnp.float32)
           .at[:, :HID2].set(w2f)).astype(jnp.bfloat16)                 # bf16 MXU path
    t2p = jnp.zeros((1, HID2_PAD), jnp.float32).at[:, :HID2].set(t2)
    w3tp = jnp.zeros((1, HID2_PAD), jnp.float32).at[:, :HID2].set(w3.T)
    b3r = b3.reshape(1, 1)
    return (w1f, t1, w2p, t2p, w3tp, b3r)


def monkeypox_forward(x_nchw, backbone_params, head_params):
    feat = resnet50_features(x_nchw, backbone_params)   # (B, S, 2048)
    return monkeypox_head(feat, *head_params)           # (B, 1)


# ----------------------------------------------------------------------------
if __name__ == "__main__":
    root = jax.random.PRNGKey(0)
    param_key, input_key = jax.random.split(root)

    kg = KeyGen(param_key)
    backbone_params = make_resnet50(kg)
    head_params = make_head(kg)

    # Small image batch (NCHW like PyTorch): batch=2, channels=3, spatial=32
    x = jax.random.normal(input_key, (2, 3, 32, 32), jnp.float32)

    out = monkeypox_forward(x, backbone_params, head_params)
    out = jax.block_until_ready(out)

    assert out.shape == (2, 1), out.shape
    assert bool(jnp.all(jnp.isfinite(out)))
    assert bool(jnp.all((out >= 0.0) & (out <= 1.0)))
    print("KERNEL_OK")
</pallas_src>

<mosaic_0001>
module attributes {stable_mosaic.version = 11 : i64} {
  func.func @head_kernel(%arg0: i32, %arg1: memref<8x1x2048xbf16, #tpu.memory_space<vmem>>, %arg2: memref<2048x256xbf16, #tpu.memory_space<vmem>>, %arg3: memref<1x256xf32, #tpu.memory_space<vmem>>, %arg4: memref<256x256xbf16, #tpu.memory_space<vmem>>, %arg5: memref<1x256xf32, #tpu.memory_space<vmem>>, %arg6: memref<1x256xf32, #tpu.memory_space<vmem>>, %arg7: memref<1x1xf32, #tpu.memory_space<vmem>>, %arg8: memref<8x1xf32, #tpu.memory_space<vmem>>) attributes {dimension_semantics = [#tpu.dimension_semantics<parallel>], iteration_bounds = array<i64: 1>, scalar_prefetch = 0 : i64, scratch_operands = 0 : i64, tpu.core_type = #tpu.core_type<tc>, window_params = [{transform_indices = @transform_0, window_bounds = array<i64: 8, 1, 2048>}, {pipeline_mode = #tpu.pipeline_mode<synchronous>, transform_indices = @transform_1, window_bounds = array<i64: 2048, 256>}, {pipeline_mode = #tpu.pipeline_mode<synchronous>, transform_indices = @transform_2, window_bounds = array<i64: 1, 256>}, {pipeline_mode = #tpu.pipeline_mode<synchronous>, transform_indices = @transform_3, window_bounds = array<i64: 256, 256>}, {pipeline_mode = #tpu.pipeline_mode<synchronous>, transform_indices = @transform_4, window_bounds = array<i64: 1, 256>}, {pipeline_mode = #tpu.pipeline_mode<synchronous>, transform_indices = @transform_5, window_bounds = array<i64: 1, 256>}, {pipeline_mode = #tpu.pipeline_mode<synchronous>, transform_indices = @transform_6, window_bounds = array<i64: 1, 1>}, {transform_indices = @transform_7, window_bounds = array<i64: 8, 1>}]} {
    %c0 = arith.constant 0 : index
    %c0_0 = arith.constant 0 : index
    %c0_1 = arith.constant 0 : index
    %0 = vector.load %arg1[%c0, %c0_0, %c0_1] : memref<8x1x2048xbf16, #tpu.memory_space<vmem>>, vector<8x1x2048xbf16>
    %1 = arith.extf %0 : vector<8x1x2048xbf16> to vector<8x1x2048xf32>
    %cst = arith.constant dense<0.000000e+00> : vector<8x2048xf32>
    %2 = vector.multi_reduction <add>, %1, %cst [1] : vector<8x1x2048xf32> to vector<8x2048xf32>
    %cst_2 = arith.constant 1.000000e+00 : f32
    %3 = vector.broadcast %cst_2 : f32 to vector<8x2048xf32>
    %4 = arith.mulf %2, %3 : vector<8x2048xf32>
    %5 = arith.truncf %4 : vector<8x2048xf32> to vector<8x2048xbf16>
    %c0_3 = arith.constant 0 : index
    %c0_4 = arith.constant 0 : index
    %6 = vector.load %arg2[%c0_3, %c0_4] : memref<2048x256xbf16, #tpu.memory_space<vmem>>, vector<2048x256xbf16>
    %cst_5 = arith.constant dense<0.000000e+00> : vector<8x256xf32>
    %7 = tpu.matmul %5, %6, %cst_5 {dimension_numbers = #tpu.dot_dimension_numbers<[1], [0], [0], [1], [0, 0, 1, 1], [], []>} : vector<8x2048xbf16>, vector<2048x256xbf16>, vector<8x256xf32> -> vector<8x256xf32>
    %c0_6 = arith.constant 0 : index
    %c0_7 = arith.constant 0 : index
    %8 = vector.load %arg3[%c0_6, %c0_7] : memref<1x256xf32, #tpu.memory_space<vmem>>, vector<1x256xf32>
    %9 = vector.broadcast %8 : vector<1x256xf32> to vector<8x256xf32>
    %10 = arith.addf %7, %9 : vector<8x256xf32>
    %cst_8 = arith.constant 0.000000e+00 : f32
    %11 = vector.broadcast %cst_8 : f32 to vector<8x256xf32>
    %12 = arith.maximumf %10, %11 : vector<8x256xf32>
    %13 = arith.truncf %12 : vector<8x256xf32> to vector<8x256xbf16>
    %c0_9 = arith.constant 0 : index
    %c0_10 = arith.constant 0 : index
    %14 = vector.load %arg4[%c0_9, %c0_10] : memref<256x256xbf16, #tpu.memory_space<vmem>>, vector<256x256xbf16>
    %cst_11 = arith.constant dense<0.000000e+00> : vector<8x256xf32>
    %15 = tpu.matmul %13, %14, %cst_11 {dimension_numbers = #tpu.dot_dimension_numbers<[1], [0], [0], [1], [0, 0, 1, 1], [], []>} : vector<8x256xbf16>, vector<256x256xbf16>, vector<8x256xf32> -> vector<8x256xf32>
    %c0_12 = arith.constant 0 : index
    %c0_13 = arith.constant 0 : index
    %16 = vector.load %arg5[%c0_12, %c0_13] : memref<1x256xf32, #tpu.memory_space<vmem>>, vector<1x256xf32>
    %17 = vector.broadcast %16 : vector<1x256xf32> to vector<8x256xf32>
    %18 = arith.addf %15, %17 : vector<8x256xf32>
    %cst_14 = arith.constant 0.000000e+00 : f32
    %19 = vector.broadcast %cst_14 : f32 to vector<8x256xf32>
    %20 = arith.maximumf %18, %19 : vector<8x256xf32>
    %c0_15 = arith.constant 0 : index
    %c0_16 = arith.constant 0 : index
    %21 = vector.load %arg6[%c0_15, %c0_16] : memref<1x256xf32, #tpu.memory_space<vmem>>, vector<1x256xf32>
    %22 = vector.broadcast %21 : vector<1x256xf32> to vector<8x256xf32>
    %23 = arith.mulf %20, %22 : vector<8x256xf32>
    %cst_17 = arith.constant dense<0.000000e+00> : vector<8xf32>
    %24 = vector.multi_reduction <add>, %23, %cst_17 [1] : vector<8x256xf32> to vector<8xf32>
    %25 = vector.shape_cast %24 : vector<8xf32> to vector<8x1xf32>
    %c0_18 = arith.constant 0 : index
    %c0_19 = arith.constant 0 : index
    %26 = vector.load %arg7[%c0_18, %c0_19] : memref<1x1xf32, #tpu.memory_space<vmem>>, vector<1x1xf32>
    %27 = vector.broadcast %26 : vector<1x1xf32> to vector<8x1xf32>
    %28 = arith.addf %25, %27 : vector<8x1xf32>
    %cst_20 = arith.constant 0.000000e+00 : f32
    %29 = vector.broadcast %cst_20 : f32 to vector<8x1xf32>
    %30 = arith.subf %29, %28 : vector<8x1xf32>
    %31 = math.exp %30 : vector<8x1xf32>
    %cst_21 = arith.constant 1.000000e+00 : f32
    %32 = vector.broadcast %cst_21 : f32 to vector<8x1xf32>
    %33 = arith.addf %32, %31 : vector<8x1xf32>
    %34 = tpu.reciprocal %33 {approx = true} : vector<8x1xf32> -> vector<8x1xf32>
    %cst_22 = arith.constant 0.000000e+00 : f32
    %cst_23 = arith.constant 1.000000e+00 : f32
    %35 = vector.broadcast %cst_22 : f32 to vector<8x1xf32>
    %36 = arith.maximumf %35, %34 : vector<8x1xf32>
    %37 = vector.broadcast %cst_23 : f32 to vector<8x1xf32>
    %38 = arith.minimumf %37, %36 : vector<8x1xf32>
    %c0_24 = arith.constant 0 : index
    %c0_25 = arith.constant 0 : index
    %39 = vector.load %arg8[%c0_24, %c0_25] : memref<8x1xf32, #tpu.memory_space<vmem>>, vector<8x1xf32>
    tpu.vector_store %arg8[%c0_24, %c0_25], %38 {strides = array<i32>} : memref<8x1xf32, #tpu.memory_space<vmem>>, vector<8x1xf32>,
    return
  }
  func.func @transform_0(%arg0: i32) -> (i32, i32, i32) {
    %c0_i32 = arith.constant 0 : i32
    %c0_i32_0 = arith.constant 0 : i32
    %c0_i32_1 = arith.constant 0 : i32
    return %arg0, %c0_i32, %c0_i32_0 : i32, i32, i32
  }
  func.func @transform_1(%arg0: i32) -> (i32, i32) {
    %c0_i32 = arith.constant 0 : i32
    %c0_i32_0 = arith.constant 0 : i32
    %c0_i32_1 = arith.constant 0 : i32
    return %c0_i32, %c0_i32_0 : i32, i32
  }
  func.func @transform_2(%arg0: i32) -> (i32, i32) {
    %c0_i32 = arith.constant 0 : i32
    %c0_i32_0 = arith.constant 0 : i32
    %c0_i32_1 = arith.constant 0 : i32
    return %c0_i32, %c0_i32_0 : i32, i32
  }
  func.func @transform_3(%arg0: i32) -> (i32, i32) {
    %c0_i32 = arith.constant 0 : i32
    %c0_i32_0 = arith.constant 0 : i32
    %c0_i32_1 = arith.constant 0 : i32
    return %c0_i32, %c0_i32_0 : i32, i32
  }
  func.func @transform_4(%arg0: i32) -> (i32, i32) {
    %c0_i32 = arith.constant 0 : i32
    %c0_i32_0 = arith.constant 0 : i32
    %c0_i32_1 = arith.constant 0 : i32
    return %c0_i32, %c0_i32_0 : i32, i32
  }
  func.func @transform_5(%arg0: i32) -> (i32, i32) {
    %c0_i32 = arith.constant 0 : i32
    %c0_i32_0 = arith.constant 0 : i32
    %c0_i32_1 = arith.constant 0 : i32
    return %c0_i32, %c0_i32_0 : i32, i32
  }
  func.func @transform_6(%arg0: i32) -> (i32, i32) {
    %c0_i32 = arith.constant 0 : i32
    %c0_i32_0 = arith.constant 0 : i32
    %c0_i32_1 = arith.constant 0 : i32
    return %c0_i32, %c0_i32_0 : i32, i32
  }
  func.func @transform_7(%arg0: i32) -> (i32, i32) {
    %c0_i32 = arith.constant 0 : i32
    %c0_i32_0 = arith.constant 0 : i32
    return %arg0, %c0_i32 : i32, i32
  }
}

</mosaic_0001>

<bundles_post_ra>
// kernel: tpu_custom_call.1
= control target key start
LH: loop header
LB: loop body
LE: loop exit
PB: predicated region body
PF: predicated region fallthrough
CT: control target
= control target key end

     0   :  { %s5060_s0 = inlined_call_operand.vmem [shape: bf16[8,1,2048], index: 0, kind: input, shape index: {}]   ;;  %s5061_s1 = inlined_call_operand.hbm [shape: bf16[2048,256], index: 1, kind: input, shape index: {}]   ;;  %s5062_s2 = inlined_call_operand.vmem [shape: f32[1,256], index: 2, kind: input, shape index: {}]   ;;  %s5063_s3 = inlined_call_operand.hbm [shape: bf16[256,256], index: 3, kind: input, shape index: {}]   ;;  %s5064_s4 = inlined_call_operand.vmem [shape: f32[1,256], index: 4, kind: input, shape index: {}]   ;;  %s5065_s5 = inlined_call_operand.vmem [shape: f32[1,256], index: 5, kind: input, shape index: {}]   ;;  %s5066_s6 = inlined_call_operand.<no memory space> [shape: f32[1,1], index: 6, kind: input, shape index: {}]   ;;  %s5067_s7 = inlined_call_operand.vmem [shape: f32[8,1], index: 7, kind: output, shape index: {}]  }
   0x1   :  { %v12_v0 = vstv %s5066_s6 }
   0x2   :  { %13 = vst [vmem:[#allocation2] sm:$0x1] %v12_v0 }
   0x3   :  { %14 = vsyncpa [#allocation4], 0 }
   0x4   :  { %15 = vsyncpa [#allocation6], 0  ;;  %s4395_s26 = smov [#allocation3]  }
   0x5   :  { %s23_s27 = sshll.u32 %s4395_s26, 4  ;;  %s24_s27 = int_to_ptr.vmem [resolvable:$true] %s23_s27 }
   0x6   :  { %s4359_s28 = scalar_lea.vmem %s24_s27, 32768  ;;  %p4364_p1 = scmp.lt.s32.totalorder %s24_s27, %s24_s27 }
   0x7   :  { %p4360_p0 = scmp.ne.s32.totalorder %s24_s27, %s4359_s28  ;;  %p4365_p2 = scmp.lt.s32.totalorder %s4359_s28, %s4359_s28 }
   0x9   :  { %p4366_p3 = por %p4365_p2, %p4364_p1 }
   0xb   :  { %p4367_p4 = pnand %p4366_p3, %p4360_p0 }
   0xd   :  { %4370 = shalt.err (!%p4367_p4)
}
   0xe   :  { %s4396_s29 = smov 128   ;;  %s4397_s30 = smov 8  }
   0xf   :  { %29 = dma.hbm_to_vmem [thread:$0]  %s5061_s1, 32768, %s24_s27, [#allocation4], %s4396_s29, %s4396_s29, %s4397_s30  }
  0x10   :  { %s4398_s6 = smov [#allocation5]  }
  0x11   :  { %s37_s10 = sshll.u32 %s4398_s6, 4  ;;  %s38_s10 = int_to_ptr.vmem [resolvable:$true] %s37_s10 }
  0x12   :  { %s4379_s11 = scalar_lea.vmem %s38_s10, 4096  ;;  %p4384_p6 = scmp.lt.s32.totalorder %s38_s10, %s38_s10 }
  0x13   :  { %p4380_p5 = scmp.ne.s32.totalorder %s38_s10, %s4379_s11  ;;  %p4385_p7 = scmp.lt.s32.totalorder %s4379_s11, %s4379_s11 }
  0x15   :  { %p4386_p8 = por %p4385_p7, %p4384_p6 }
  0x17   :  { %p4387_p9 = pnand %p4386_p8, %p4380_p5 }
  0x19   :  { %4390 = shalt.err (!%p4387_p9)
}
  0x1a   :  { %43 = dma.hbm_to_vmem [thread:$0]  %s5063_s3, 4096, %s38_s10, [#allocation6], %s4396_s29, %s4396_s29, %s4397_s30  }
  0x1b   :  { %4391 = dma.done.wait [#allocation4], 32768  }
  0x1c   :  { %4392 = vsyncadd [#allocation4], 4294934528 }
  0x1d   :  { %4393 = dma.done.wait [#allocation6], 4096  }
  0x1e   :  { %4394 = vsyncadd [#allocation6], 4294963200  ;;  %v3915_v1 = vld [vmem:[#allocation3 + $0x74] ss:$8 sps:$4 sm:$0xff]   ;;  %v3919_v3 = vld [vmem:[#allocation3 + $0x70] ss:$8 sps:$4 sm:$0xff]   ;;  %v168_v40 = vlaneseq }
  0x1f   :  { %v3917_v2 = vld [vmem:[#allocation3 + $0x174] ss:$8 sps:$4 sm:$0xff]   ;;  %3003 = vmatprep.subr.bf16.mxu0 %v3915_v1  ;;  %v3920_v4 = vld [vmem:[#allocation3 + $0x170] ss:$8 sps:$4 sm:$0xff]   ;;  %v3921_v5 = vld [vmem:[#allocation3 + $0x64] ss:$8 sps:$4 sm:$0xff]  }
  0x20   :  { %3044 = vmatprep.subr.bf16.mxu1 %v3917_v2  ;;  %3004 = vmatpush1.bf16.msra.mxu0 %v3919_v3  ;;  %v3923_v6 = vld [vmem:[#allocation3 + $0x164] ss:$8 sps:$4 sm:$0xff]   ;;  %v3925_v7 = vld [vmem:[#allocation3 + $0x60] ss:$8 sps:$4 sm:$0xff]   ;;  %v3927_v9 = vld [vmem:[#allocation3 + $0x54] ss:$8 sps:$4 sm:$0xff]  }
  0x21   :  { %3045 = vmatpush1.bf16.msra.mxu1 %v3920_v4  ;;  %3005 = vmatprep.subr.bf16.mxu0 %v3921_v5  ;;  %v3926_v8 = vld [vmem:[#allocation3 + $0x160] ss:$8 sps:$4 sm:$0xff]   ;;  %v3929_v10 = vld [vmem:[#allocation3 + $0x154] ss:$8 sps:$4 sm:$0xff]   ;;  %v3931_v11 = vld [vmem:[#allocation3 + $0x50] ss:$8 sps:$4 sm:$0xff]  }
  0x22   :  { %3046 = vmatprep.subr.bf16.mxu1 %v3923_v6  ;;  %v3932_v12 = vld [vmem:[#allocation3 + $0x150] ss:$8 sps:$4 sm:$0xff]   ;;  %v3933_v13 = vld [vmem:[#allocation3 + $0x44] ss:$8 sps:$4 sm:$0xff]   ;;  %v3937_v15 = vld [vmem:[#allocation3 + $0x40] ss:$8 sps:$4 sm:$0xff]  }
  0x23   :  { %v3935_v14 = vld [vmem:[#allocation3 + $0x144] ss:$8 sps:$4 sm:$0xff]   ;;  %v3938_v16 = vld [vmem:[#allocation3 + $0x140] ss:$8 sps:$4 sm:$0xff]   ;;  %v3939_v17 = vld [vmem:[#allocation3 + $0x34] ss:$8 sps:$4 sm:$0xff]  }
  0x24   :  { %3006 = vmatpush1.bf16.msra.mxu0 %v3925_v7  ;;  %v3941_v18 = vld [vmem:[#allocation3 + $0x134] ss:$8 sps:$4 sm:$0xff]   ;;  %v3943_v19 = vld [vmem:[#allocation3 + $0x30] ss:$8 sps:$4 sm:$0xff]   ;;  %v3945_v21 = vld [vmem:[#allocation3 + $0x24] ss:$8 sps:$4 sm:$0xff]  }
  0x25   :  { %3047 = vmatpush1.bf16.msra.mxu1 %v3926_v8  ;;  %3007 = vmatprep.subr.bf16.mxu0 %v3927_v9  ;;  %v3944_v20 = vld [vmem:[#allocation3 + $0x130] ss:$8 sps:$4 sm:$0xff]   ;;  %v3947_v22 = vld [vmem:[#allocation3 + $0x124] ss:$8 sps:$4 sm:$0xff]   ;;  %v3949_v23 = vld [vmem:[#allocation3 + $0x20] ss:$8 sps:$4 sm:$0xff]  }
  0x26   :  { %3048 = vmatprep.subr.bf16.mxu1 %v3929_v10  ;;  %v3950_v24 = vld [vmem:[#allocation3 + $0x120] ss:$8 sps:$4 sm:$0xff]   ;;  %v3951_v25 = vld [vmem:[#allocation3 + $0x14] ss:$8 sps:$4 sm:$0xff]   ;;  %v3955_v27 = vld [vmem:[#allocation3 + $0x10] ss:$8 sps:$4 sm:$0xff]  }
  0x27   :  { %v3953_v26 = vld [vmem:[#allocation3 + $0x114] ss:$8 sps:$4 sm:$0xff]   ;;  %v3956_v28 = vld [vmem:[#allocation3 + $0x110] ss:$8 sps:$4 sm:$0xff]   ;;  %v3957_v29 = vld [vmem:[#allocation3 + $0x4] ss:$8 sps:$4 sm:$0xff]  }
  0x28   :  { %3008 = vmatpush1.bf16.msra.mxu0 %v3931_v11  ;;  %v3959_v30 = vld [vmem:[#allocation3 + $0x104] ss:$8 sps:$4 sm:$0xff]   ;;  %v3961_v31 = vld [vmem:[#allocation3] ss:$8 sps:$4 sm:$0xff]   ;;  %v3963_v33 = vld [vmem:[#allocation3 + $0xf4] ss:$8 sps:$4 sm:$0xff]  }
  0x29   :  { %3049 = vmatpush1.bf16.msra.mxu1 %v3932_v12  ;;  %3009 = vmatprep.subr.bf16.mxu0 %v3933_v13  ;;  %v3962_v32 = vld [vmem:[#allocation3 + $0x100] ss:$8 sps:$4 sm:$0xff]   ;;  %v3965_v34 = vld [vmem:[#allocation3 + $0x1f4] ss:$8 sps:$4 sm:$0xff]   ;;  %v3967_v35 = vld [vmem:[#allocation3 + $0xf0] ss:$8 sps:$4 sm:$0xff]  }
  0x2a   :  { %3050 = vmatprep.subr.bf16.mxu1 %v3935_v14  ;;  %v3968_v36 = vld [vmem:[#allocation3 + $0x1f0] ss:$8 sps:$4 sm:$0xff]   ;;  %v3969_v37 = vld [vmem:[#allocation3 + $0xe4] ss:$8 sps:$4 sm:$0xff]   ;;  %v3973_v39 = vld [vmem:[#allocation3 + $0xe0] ss:$8 sps:$4 sm:$0xff]  }
  0x2b   :  { %v3971_v38 = vld [vmem:[#allocation3 + $0x1e4] ss:$8 sps:$4 sm:$0xff]   ;;  %v3974_v41 = vld [vmem:[#allocation3 + $0x1e0] ss:$8 sps:$4 sm:$0xff]   ;;  %v3975_v42 = vld [vmem:[#allocation3 + $0xd4] ss:$8 sps:$4 sm:$0xff]  }
  0x2c   :  { %3010 = vmatpush1.bf16.msra.mxu0 %v3937_v15  ;;  %v3977_v43 = vld [vmem:[#allocation3 + $0x1d4] ss:$8 sps:$4 sm:$0xff]   ;;  %v3979_v44 = vld [vmem:[#allocation3 + $0xd0] ss:$8 sps:$4 sm:$0xff]   ;;  %v4448_v46 = vshrl.u32 %v168_v40, 7  ;;  %vm1461_vm0 = vcmask 1041409  }
  0x2d   :  { %3051 = vmatpush1.bf16.msra.mxu1 %v3938_v16  ;;  %3011 = vmatprep.subr.bf16.mxu0 %v3939_v17  ;;  %v3980_v45 = vld [vmem:[#allocation3 + $0x1d0] ss:$8 sps:$4 sm:$0xff]   ;;  %v3981_v47 = vld [vmem:[#allocation3 + $0xc4] ss:$8 sps:$4 sm:$0xff]   ;;  %v3985_v49 = vld [vmem:[#allocation3 + $0xc0] ss:$8 sps:$4 sm:$0xff]  }
  0x2e   :  { %3052 = vmatprep.subr.bf16.mxu1 %v3941_v18  ;;  %v3983_v48 = vld [vmem:[#allocation3 + $0x1c4] ss:$8 sps:$4 sm:$0xff]   ;;  %v3986_v50 = vld [vmem:[#allocation3 + $0x1c0] ss:$8 sps:$4 sm:$0xff]   ;;  %v3987_v52 = vld [vmem:[#allocation3 + $0xb4] ss:$8 sps:$4 sm:$0xff]  }
  0x2f   :  { %v56_v51 = vld [vmem:[%s5060_s0] sm:$0xff]  ;;  %v58_v54 = vld [vmem:[%s5060_s0 + $0x10] sm:$0xff]  ;;  %v4465_v58 = vsub.s32 2, %v4448_v46  ;;  %v4485_v0 = vsub.s32 0, %v4448_v46  ;;  %v4497_v4 = vsub.s32 6, %v4448_v46  ;;  %v4500_v5 = vsub.s32 4, %v4448_v46 }
  0x30   :  { %3012 = vmatpush1.bf16.msra.mxu0 %v3943_v19  ;;  %v3989_v53 = vld [vmem:[#allocation3 + $0x1b4] ss:$8 sps:$4 sm:$0xff]   ;;  %v4462_v57 = vunpack.c.l.bf16 %v56_v51  ;;  %v4480_v62 = vunpack.c.l.bf16 %v58_v54  ;;  %v4502_v6 = vunpack.c.h.bf16 %v56_v51  ;;  %v4504_v7 = vunpack.c.h.bf16 %v58_v54  ;;  %v3991_v10 = vld [vmem:[#allocation3 + $0xb0] ss:$8 sps:$4 sm:$0xff]   ;;  %v3993_v16 = vld [vmem:[#allocation3 + $0xa4] ss:$8 sps:$4 sm:$0xff]  }
  0x31   :  { %3053 = vmatpush1.bf16.msra.mxu1 %v3944_v20  ;;  %3013 = vmatprep.subr.bf16.mxu0 %v3945_v21  ;;  %v60_v55 = vld [vmem:[%s5060_s0 + $0x20] sm:$0xff]  ;;  %v62_v56 = vld [vmem:[%s5060_s0 + $0x30] sm:$0xff]  ;;  %vm1464_vm1 = vcmask 1042434   ;;  %vm1467_vm2 = vcmask 1043459   ;;  %vm1470_vm3 = vcmask 1044484   ;;  %vm1473_vm4 = vcmask 1045509  }
  0x32   :  { %3054 = vmatprep.subr.bf16.mxu1 %v3947_v22  ;;  %v64_v59 = vld [vmem:[%s5060_s0 + $0x40] sm:$0xff]  ;;  %v4473_v60 = vld [vmem:[%s5060_s0 + $0x50] sm:$0xff]  ;;  %v4482_v63 = vunpack.c.l.bf16 %v60_v55  ;;  %v4492_v2 = vunpack.c.l.bf16 %v62_v56  ;;  %v4512_v12 = vunpack.c.h.bf16 %v60_v55  ;;  %v175_v14 = vrot.slane %v4462_v57, %v4465_v58 }
  0x33   :  { %v4478_v61 = vld [vmem:[%s5060_s0 + $0x60] sm:$0xff]  ;;  %v4490_v1 = vld [vmem:[%s5060_s0 + $0x70] sm:$0xff]  ;;  %v4494_v3 = vunpack.c.l.bf16 %v64_v59  ;;  %v4507_v8 = vunpack.c.l.bf16 %v4473_v60  ;;  %v239_v15 = vrot.slane %v4480_v62, %v4465_v58  ;;  %v4521_v17 = vunpack.c.h.bf16 %v62_v56 }
  0x34   :  { %3014 = vmatpush1.bf16.msra.mxu0 %v3949_v23  ;;  %v4510_v9 = vunpack.c.l.bf16 %v4478_v61  ;;  %v3992_v11 = vld [vmem:[#allocation3 + $0x1b0] ss:$8 sps:$4 sm:$0xff]   ;;  %v4515_v13 = vunpack.c.l.bf16 %v4490_v1  ;;  %v303_v18 = vrot.slane %v4482_v63, %v4465_v58  ;;  %v367_v19 = vrot.slane %v4492_v2, %v4465_v58  ;;  %v3995_v21 = vld [vmem:[#allocation3 + $0x1a4] ss:$8 sps:$4 sm:$0xff]  }
  0x35   :  { %3055 = vmatpush1.bf16.msra.mxu1 %v3950_v24  ;;  %3015 = vmatprep.subr.bf16.mxu0 %v3951_v25  ;;  %v431_v20 = vrot.slane %v4494_v3, %v4465_v58  ;;  %v4529_v22 = vunpack.c.h.bf16 %v64_v59  ;;  %v495_v23 = vrot.slane %v4507_v8, %v4465_v58  ;;  %vm1476_vm5 = vcmask 1046534   ;;  %v4003_v51 = vld [vmem:[#allocation3 + $0x90] ss:$8 sps:$4 sm:$0xff]   ;;  %v4005_v59 = vld [vmem:[#allocation3 + $0x84] ss:$8 sps:$4 sm:$0xff]  }
  0x36   :  { %3056 = vmatprep.subr.bf16.mxu1 %v3953_v26  ;;  %v559_v24 = vrot.slane %v4510_v9, %v4465_v58  ;;  %v623_v25 = vrot.slane %v4515_v13, %v4465_v58  ;;  %v809_v26 = vpack.c.bf16 %v175_v14, %v175_v14  ;;  %vm1479_vm6 = vcmask 1047559   ;;  %v4004_v56 = vld [vmem:[#allocation3 + $0x190] ss:$8 sps:$4 sm:$0xff]  }
  0x37   :  { %v183_v55 = vrot.slane %v4462_v57, %v4497_v4  ;;  %v311_v14 = vrot.slane %v4482_v63, %v4497_v4  ;;  %vm3614_vm7 = vcmask 7168  }
  0x38   :  { %3016 = vmatpush1.bf16.msra.mxu0 %v3955_v27  ;;  %v825_v27 = vpack.c.bf16 %v239_v15, %v239_v15 }
  0x39   :  { %3057 = vmatpush1.bf16.msra.mxu1 %v3956_v28  ;;  %3017 = vmatprep.subr.bf16.mxu0 %v3957_v29  ;;  %v841_v28 = vpack.c.bf16 %v303_v18, %v303_v18  ;;  %v857_v29 = vpack.c.bf16 %v367_v19, %v367_v19  ;;  %v375_v18 = vrot.slane %v4492_v2, %v4497_v4 }
  0x3a   :  { %3058 = vmatprep.subr.bf16.mxu1 %v3959_v30  ;;  %v3997_v30 = vld [vmem:[#allocation3 + $0xa0] ss:$8 sps:$4 sm:$0xff]   ;;  %v439_v19 = vrot.slane %v4494_v3, %v4497_v4 }
  0x3b   :  { %v1381_v40 = vunpack.c.l.b16 %v857_v29  ;;  %v4009_v29 = vld [vmem:[#allocation3 + $0x80] ss:$8 sps:$4 sm:$0xff]  }
  0x3c   :  { %3018 = vmatpush1.bf16.msra.mxu0 %v3961_v31  ;;  %v3998_v31 = vld [vmem:[#allocation3 + $0x1a0] ss:$8 sps:$4 sm:$0xff]  }
  0x3d   :  { %3059 = vmatpush1.bf16.msra.mxu1 %v3962_v32  ;;  %3019 = vmatprep.subr.bf16.mxu0 %v3963_v33  ;;  %v873_v32 = vpack.c.bf16 %v431_v20, %v431_v20  ;;  %v889_v33 = vpack.c.bf16 %v495_v23, %v495_v23  ;;  %v567_v23 = vrot.slane %v4510_v9, %v4497_v4 }
  0x3e   :  { %3060 = vmatprep.subr.bf16.mxu1 %v3965_v34  ;;  %v905_v34 = vpack.c.bf16 %v559_v24, %v559_v24  ;;  %v631_v24 = vrot.slane %v4515_v13, %v4497_v4 }
  0x40   :  { %3020 = vmatpush2.bf16.msra.mxu0 %v3967_v35  ;;  %v921_v35 = vpack.c.bf16 %v623_v25, %v623_v25 }
  0x41   :  { %3061 = vmatpush2.bf16.msra.mxu1 %v3968_v36  ;;  %3021 = vmatprep.subr.bf16.mxu0 %v3969_v37  ;;  %v3999_v36 = vld [vmem:[#allocation3 + $0x94] ss:$8 sps:$4 sm:$0xff]   ;;  %v1333_v37 = vunpack.c.l.b16 %v809_v26  ;;  %v811_v26 = vpack.c.bf16 %v183_v55, %v183_v55 }
  0x42   :  { %3062 = vmatprep.subr.bf16.mxu1 %v3971_v38  ;;  %v1349_v38 = vunpack.c.l.b16 %v825_v27 }
  0x44   :  { %3022 = vmatpush2.bf16.msra.mxu0 %v3973_v39  ;;  %v1365_v39 = vunpack.c.l.b16 %v841_v28  ;;  %v843_v28 = vpack.c.bf16 %v311_v14, %v311_v14 }
  0x45   :  { %3063 = vmatpush2.bf16.msra.mxu1 %v3974_v41  ;;  %3023 = vmatprep.subr.bf16.mxu0 %v3975_v42  ;;  %v4001_v41 = vld [vmem:[#allocation3 + $0x194] ss:$8 sps:$4 sm:$0xff]   ;;  %v1397_v42 = vunpack.c.l.b16 %v873_v32 }
  0x46   :  { %3064 = vmatprep.subr.bf16.mxu1 %v3977_v43  ;;  %v1413_v43 = vunpack.c.l.b16 %v889_v33  ;;  %v859_v33 = vpack.c.bf16 %v375_v18, %v375_v18  ;;  %v363_v18 = vrot.slane %v4492_v2, %v4485_v0 }
  0x48   :  { %3024 = vmatpush2.bf16.msra.mxu0 %v3979_v44  ;;  %v1429_v44 = vunpack.c.l.b16 %v905_v34  ;;  %v1489_v54 = vrot.slane %v1413_v43, 3  ;;  %v875_v34 = vpack.c.bf16 %v439_v19, %v439_v19  ;;  %v1367_v43 = vunpack.c.l.b16 %v843_v28 }
  0x49   :  { %3065 = vmatpush2.bf16.msra.mxu1 %v3980_v45  ;;  %3025 = vmatprep.subr.bf16.mxu0 %v3981_v47  ;;  %v1445_v45 = vunpack.c.l.b16 %v921_v35  ;;  %v4538_v47 = vunpack.c.h.bf16 %v4473_v60  ;;  %v427_v19 = vrot.slane %v4494_v3, %v4485_v0 }
  0x4a   :  { %3066 = vmatprep.subr.bf16.mxu1 %v3983_v48  ;;  %v1481_v48 = vrot.slane %v1349_v38, 7  ;;  %v1491_v60 = vrot.slane %v1429_v44, 2  ;;  %v1335_v38 = vunpack.c.l.b16 %v811_v26  ;;  %v4016_v44 = vld [vmem:[#allocation3 + $0x374] ss:$8 sps:$4 sm:$0xff]  }
  0x4c   :  { %3026 = vmatpush2.bf16.msra.mxu0 %v3985_v49  ;;  %v1483_v49 = vrot.slane %v1365_v39, 6  ;;  %v4013_v39 = vld [vmem:[#allocation3 + $0x274] ss:$8 sps:$4 sm:$0xff]  }
  0x4d   :  { %3067 = vmatpush2.bf16.msra.mxu1 %v3986_v50  ;;  %3027 = vmatprep.subr.bf16.mxu0 %v3987_v52  ;;  %v1485_v50 = vrot.slane %v1381_v40, 5  ;;  %v4541_v52 = vunpack.c.h.bf16 %v4478_v61  ;;  %v4007_v61 = vld [vmem:[#allocation3 + $0x184] ss:$8 sps:$4 sm:$0xff]  }
  0x4e   :  { %3068 = vmatprep.subr.bf16.mxu1 %v3989_v53  ;;  %v1487_v53 = vrot.slane %v1397_v42, 4 }
  0x50   :  { %3028 = vmatpush2.bf16.msra.mxu0 %v3991_v10  ;;  %v1482_v10 = vsel %vm1461_vm0, %v1481_v48, %v1333_v37  ;;  %v907_v37 = vpack.c.bf16 %v567_v23, %v567_v23  ;;  %v1399_v48 = vunpack.c.l.b16 %v875_v34  ;;  %v555_v23 = vrot.slane %v4510_v9, %v4485_v0 }
  0x51   :  { %3069 = vmatpush2.bf16.msra.mxu1 %v3992_v11  ;;  %3029 = vmatprep.subr.bf16.mxu0 %v3993_v16  ;;  %v247_v11 = vrot.slane %v4480_v62, %v4497_v4  ;;  %v1484_v15 = vsel %vm1464_vm1, %v1483_v49, %v1482_v10  ;;  %v1493_v16 = vrot.slane %v1445_v45, 1  ;;  %v1383_v45 = vunpack.c.l.b16 %v859_v33 }
  0x52   :  { %3070 = vmatprep.subr.bf16.mxu1 %v3995_v21  ;;  %v1486_v20 = vsel %vm1467_vm2, %v1485_v50, %v1484_v15  ;;  %v503_v21 = vrot.slane %v4507_v8, %v4497_v4  ;;  %v1431_v50 = vunpack.c.l.b16 %v907_v37  ;;  %v171_v10 = vrot.slane %v4462_v57, %v4485_v0 }
  0x53   :  { %v1488_v25 = vsel %vm1470_vm3, %v1487_v53, %v1486_v20  ;;  %v827_v27 = vpack.c.bf16 %v247_v11, %v247_v11  ;;  %v1513_v55 = vrot.slane %v1383_v45, 5 }
  0x54   :  { %3030 = vmatpush2.bf16.msra.mxu0 %v3997_v30  ;;  %v4010_v30 = vld [vmem:[#allocation3 + $0x180] ss:$8 sps:$4 sm:$0xff]   ;;  %v1490_v32 = vsel %vm1473_vm4, %v1489_v54, %v1488_v25  ;;  %v1511_v54 = vrot.slane %v1367_v43, 6  ;;  %v1519_v11 = vrot.slane %v1431_v50, 2  ;;  %v808_v26 = vpack.c.bf16 %v171_v10, %v171_v10 }
  0x55   :  { %3071 = vmatpush2.bf16.msra.mxu1 %v3998_v31  ;;  %3031 = vmatprep.subr.bf16.mxu0 %v3999_v36  ;;  %v4564_v31 = vunpack.c.h.bf16 %v4490_v1  ;;  %v1492_v35 = vsel %vm1476_vm5, %v1491_v60, %v1490_v32  ;;  %v891_v36 = vpack.c.bf16 %v503_v21, %v503_v21  ;;  %v1351_v42 = vunpack.c.l.b16 %v827_v27 }
  0x56   :  { %3072 = vmatprep.subr.bf16.mxu1 %v4001_v41  ;;  %v1494_v40 = vsel %vm1479_vm6, %v1493_v16, %v1492_v35  ;;  %v923_v41 = vpack.c.bf16 %v631_v24, %v631_v24  ;;  %v299_v16 = vrot.slane %v4482_v63, %v4485_v0  ;;  %v491_v21 = vrot.slane %v4507_v8, %v4485_v0 }
  0x57   :  { %v1692_v1 = vpack.c.b16 %v1494_v40, %v1494_v40  ;;  %v1415_v49 = vunpack.c.l.b16 %v891_v36  ;;  %v1509_v53 = vrot.slane %v1351_v42, 7  ;;  %v619_v24 = vrot.slane %v4515_v13, %v4485_v0 }
  0x58   :  { %3032 = vmatpush2.bf16.msra.mxu0 %v4003_v51  ;;  %v1447_v51 = vunpack.c.l.b16 %v923_v41  ;;  %v840_v28 = vpack.c.bf16 %v299_v16, %v299_v16  ;;  %v872_v32 = vpack.c.bf16 %v427_v19, %v427_v19  ;;  %v888_v33 = vpack.c.bf16 %v491_v21, %v491_v21 }
  0x59   :  { %3073 = vmatpush2.bf16.msra.mxu1 %v4004_v56  ;;  %3033 = vmatprep.subr.bf16.mxu0 %v4005_v59  ;;  %v1515_v56 = vrot.slane %v1399_v48, 4  ;;  %v1517_v59 = vrot.slane %v1415_v49, 3  ;;  %v1510_v60 = vsel %vm1461_vm0, %v1509_v53, %v1335_v38  ;;  %v904_v35 = vpack.c.bf16 %v555_v23, %v555_v23 }
  0x5a   :  { %3074 = vmatprep.subr.bf16.mxu1 %v4007_v61  ;;  %3035 = vmatprep.mubr.bf16.mxu0 %v1692_v1  ;;  %v1521_v14 = vrot.slane %v1447_v51, 1  ;;  %v235_v61 = vrot.slane %v4480_v62, %v4485_v0  ;;  %v1512_v15 = vsel %vm1464_vm1, %v1511_v54, %v1510_v60  ;;  %v920_v36 = vpack.c.bf16 %v619_v24, %v619_v24 }
  0x5b   :  { %v1514_v20 = vsel %vm1467_vm2, %v1513_v55, %v1512_v15  ;;  %v1332_v37 = vunpack.c.l.b16 %v808_v26  ;;  %v1364_v40 = vunpack.c.l.b16 %v840_v28  ;;  %v1396_v43 = vunpack.c.l.b16 %v872_v32 }
  0x5c   :  { %3034 = vmatpush2.bf16.msra.mxu0 %v4009_v29  ;;  %v1516_v25 = vsel %vm1470_vm3, %v1515_v56, %v1514_v20  ;;  %v824_v27 = vpack.c.bf16 %v235_v61, %v235_v61  ;;  %v1428_v1 = vunpack.c.l.b16 %v904_v35  ;;  %v1444_v45 = vunpack.c.l.b16 %v920_v36  ;;  %v4019_v36 = vld [vmem:[#allocation3 + $0x264] ss:$8 sps:$4 sm:$0xff]  }
  0x5d   :  { %3075 = vmatpush2.bf16.msra.mxu1 %v4010_v30  ;;  %3085 = vmatprep.subr.bf16.mxu0 %v4013_v39  ;;  %v1518_v29 = vsel %vm1473_vm4, %v1517_v59, %v1516_v25  ;;  %v856_v30 = vpack.c.bf16 %v363_v18, %v363_v18  ;;  %v1463_v49 = vrot.slane %v1364_v40, 6  ;;  %v1469_v51 = vrot.slane %v1396_v43, 4 }
  0x5e   :  { %3126 = vmatprep.subr.bf16.mxu1 %v4016_v44  ;;  %v1520_v34 = vsel %vm1476_vm5, %v1519_v11, %v1518_v29  ;;  %v1348_v39 = vunpack.c.l.b16 %v824_v27  ;;  %v1412_v44 = vunpack.c.l.b16 %v888_v33  ;;  %v1475_v54 = vrot.slane %v1428_v1, 2 }
  0x5f   :  { %v1522_v38 = vsel %vm1479_vm6, %v1521_v14, %v1520_v34  ;;  %v1380_v41 = vunpack.c.l.b16 %v856_v30  ;;  %v179_v55 = vrot.slane %v4462_v57, %v4500_v5  ;;  %v1478_v59 = vrot.slane %v1444_v45, 1  ;;  %v4011_v30 = vld [vmem:[#allocation3 + $0x270] ss:$8 sps:$4 sm:$0xff]   ;;  %v4017_v45 = vld [vmem:[#allocation3 + $0x260] ss:$8 sps:$4 sm:$0xff]  }
  0x60   :  { %v1694_v42 = vpack.c.b16 %v1522_v38, %v1522_v38  ;;  %v1460_v48 = vrot.slane %v1348_v39, 7  ;;  %v1472_v53 = vrot.slane %v1412_v44, 3  ;;  %v243_v10 = vrot.slane %v4480_v62, %v4500_v5 }
  0x61   :  { %v1466_v50 = vrot.slane %v1380_v41, 5  ;;  %v307_v60 = vrot.slane %v4482_v63, %v4500_v5  ;;  %v371_v14 = vrot.slane %v4492_v2, %v4500_v5  ;;  %v435_v61 = vrot.slane %v4494_v3, %v4500_v5 }
  0x62   :  { %3076 = vmatprep.mubr.bf16.mxu1 %v1694_v42  ;;  %v1462_v56 = vsel %vm1461_vm0, %v1460_v48, %v1332_v37  ;;  %v499_v57 = vrot.slane %v4507_v8, %v4500_v5  ;;  %v563_v16 = vrot.slane %v4510_v9, %v4500_v5  ;;  %v627_v62 = vrot.slane %v4515_v13, %v4500_v5 }
  0x63   :  { %v1465_v11 = vsel %vm1464_vm1, %v1463_v49, %v1462_v56  ;;  %v810_v63 = vpack.c.bf16 %v179_v55, %v179_v55  ;;  %v826_v19 = vpack.c.bf16 %v243_v10, %v243_v10  ;;  %v842_v20 = vpack.c.bf16 %v307_v60, %v307_v60 }
  0x64   :  { %v1468_v15 = vsel %vm1467_vm2, %v1466_v50, %v1465_v11  ;;  %v858_v2 = vpack.c.bf16 %v371_v14, %v371_v14  ;;  %v874_v3 = vpack.c.bf16 %v435_v61, %v435_v61  ;;  %v890_v23 = vpack.c.bf16 %v499_v57, %v499_v57 }
  0x65   :  { %v1471_v18 = vsel %vm1470_vm3, %v1469_v51, %v1468_v15  ;;  %v906_v24 = vpack.c.bf16 %v563_v16, %v563_v16  ;;  %v922_v25 = vpack.c.bf16 %v627_v62, %v627_v62  ;;  %v1334_v26 = vunpack.c.l.b16 %v810_v63  ;;  %v4023_v62 = vld [vmem:[#allocation3 + $0x250] ss:$8 sps:$4 sm:$0xff]  }
  0x66   :  { %v1474_v21 = vsel %vm1473_vm4, %v1472_v53, %v1471_v18  ;;  %v1350_v27 = vunpack.c.l.b16 %v826_v19  ;;  %v1366_v28 = vunpack.c.l.b16 %v842_v20  ;;  %v1382_v13 = vunpack.c.l.b16 %v858_v2  ;;  %v4025_v53 = vld [vmem:[#allocation3 + $0x254] ss:$8 sps:$4 sm:$0xff]   ;;  %v4031_v2 = vld [vmem:[#allocation3 + $0x244] ss:$8 sps:$4 sm:$0xff]  }
  0x67   :  { %v1477_v8 = vsel %vm1476_vm5, %v1475_v54, %v1474_v21  ;;  %v1398_v29 = vunpack.c.l.b16 %v874_v3  ;;  %v1414_v33 = vunpack.c.l.b16 %v890_v23  ;;  %v1430_v34 = vunpack.c.l.b16 %v906_v24 }
  0x68   :  { %v1480_v9 = vsel %vm1479_vm6, %v1478_v59, %v1477_v8  ;;  %v1446_v35 = vunpack.c.l.b16 %v922_v25  ;;  %v1495_v37 = vrot.slane %v1350_v27, 7  ;;  %v1497_v38 = vrot.slane %v1366_v28, 6  ;;  %v4014_v8 = vld [vmem:[#allocation3 + $0x370] ss:$8 sps:$4 sm:$0xff]   ;;  %v4022_v28 = vld [vmem:[#allocation3 + $0x364] ss:$8 sps:$4 sm:$0xff]  }
  0x69   :  { %v1691_v32 = vpack.c.b16 %v1480_v9, %v1480_v9  ;;  %v1499_v39 = vrot.slane %v1382_v13, 5  ;;  %v1501_v40 = vrot.slane %v1398_v29, 4  ;;  %v1503_v41 = vrot.slane %v1414_v33, 3  ;;  %v4029_v13 = vld [vmem:[#allocation3 + $0x240] ss:$8 sps:$4 sm:$0xff]  }
  0x6a   :  { %v1505_v42 = vrot.slane %v1430_v34, 2  ;;  %v1507_v43 = vrot.slane %v1446_v35, 1  ;;  %v191_v44 = vrot.slane %v4502_v6, %v4465_v58  ;;  %v1496_v1 = vsel %vm1461_vm0, %v1495_v37, %v1334_v26  ;;  %v4037_v37 = vld [vmem:[#allocation3 + $0x234] ss:$8 sps:$4 sm:$0xff]  }
  0x6b   :  { %3036 = vmatmul.mubr.bf16.vlgmr.msra.gmra.mxu0 %v1691_v32  ;;  %v255_v48 = vrot.slane %v4504_v7, %v4465_v58  ;;  %v319_v49 = vrot.slane %v4512_v12, %v4465_v58  ;;  %v383_v50 = vrot.slane %v4521_v17, %v4465_v58  ;;  %v1498_v51 = vsel %vm1464_vm1, %v1497_v38, %v1496_v1 }
  0x6c   :  { %3086 = vmatpush1.bf16.msra.mxu0 %v4011_v30  ;;  %v447_v54 = vrot.slane %v4529_v22, %v4465_v58  ;;  %v511_v55 = vrot.slane %v4538_v47, %v4465_v58  ;;  %v575_v56 = vrot.slane %v4541_v52, %v4465_v58  ;;  %v1500_v59 = vsel %vm1467_vm2, %v1499_v39, %v1498_v51 }
  0x6d   :  { %3087 = vmatprep.subr.bf16.mxu0 %v4019_v36  ;;  %v639_v10 = vrot.slane %v4564_v31, %v4465_v58  ;;  %v813_v60 = vpack.c.bf16 %v191_v44, %v191_v44  ;;  %v829_v11 = vpack.c.bf16 %v255_v48, %v255_v48  ;;  %v1502_v14 = vsel %vm1470_vm3, %v1501_v40, %v1500_v59  ;;  %v4028_v48 = vld [vmem:[#allocation3 + $0x354] ss:$8 sps:$4 sm:$0xff]  }
  0x6e   :  { %v845_v61 = vpack.c.bf16 %v319_v49, %v319_v49  ;;  %v861_v57 = vpack.c.bf16 %v383_v50, %v383_v50  ;;  %v877_v15 = vpack.c.bf16 %v447_v54, %v447_v54  ;;  %v1504_v16 = vsel %vm1473_vm4, %v1503_v41, %v1502_v14  ;;  %v4035_v54 = vld [vmem:[#allocation3 + $0x230] ss:$8 sps:$4 sm:$0xff]  }
  0x6f   :  { %v893_v63 = vpack.c.bf16 %v511_v55, %v511_v55  ;;  %v909_v18 = vpack.c.bf16 %v575_v56, %v575_v56  ;;  %v925_v19 = vpack.c.bf16 %v639_v10, %v639_v10  ;;  %v1506_v20 = vsel %vm1476_vm5, %v1505_v42, %v1504_v16  ;;  %v4020_v42 = vld [vmem:[#allocation3 + $0x360] ss:$8 sps:$4 sm:$0xff]  }
  0x70   :  { %3088 = vmatpush1.bf16.msra.mxu0 %v4017_v45  ;;  %v1337_v21 = vunpack.c.l.b16 %v813_v60  ;;  %v1353_v3 = vunpack.c.l.b16 %v829_v11  ;;  %v1369_v23 = vunpack.c.l.b16 %v845_v61  ;;  %v1508_v24 = vsel %vm1479_vm6, %v1507_v43, %v1506_v20  ;;  %v4043_v60 = vld [vmem:[#allocation3 + $0x224] ss:$8 sps:$4 sm:$0xff]  }
  0x71   :  { %3089 = vmatprep.subr.bf16.mxu0 %v4025_v53  ;;  %v1385_v25 = vunpack.c.l.b16 %v861_v57  ;;  %v1401_v26 = vunpack.c.l.b16 %v877_v15  ;;  %v1417_v27 = vunpack.c.l.b16 %v893_v63  ;;  %v1693_v9 = vpack.c.b16 %v1508_v24, %v1508_v24  ;;  %v4026_v15 = vld [vmem:[#allocation3 + $0x350] ss:$8 sps:$4 sm:$0xff]  }
  0x72   :  { %v1433_v29 = vunpack.c.l.b16 %v909_v18  ;;  %v1449_v30 = vunpack.c.l.b16 %v925_v19  ;;  %v1537_v32 = vrot.slane %v1353_v3, 7  ;;  %v1539_v33 = vrot.slane %v1369_v23, 6  ;;  %v4034_v19 = vld [vmem:[#allocation3 + $0x344] ss:$8 sps:$4 sm:$0xff]   ;;  %v4041_v23 = vld [vmem:[#allocation3 + $0x220] ss:$8 sps:$4 sm:$0xff]  }
  0x73   :  { %v1541_v34 = vrot.slane %v1385_v25, 5  ;;  %v1543_v35 = vrot.slane %v1401_v26, 4  ;;  %v1545_v36 = vrot.slane %v1417_v27, 3  ;;  %3077 = vmatmul.mubr.bf16.vlgmr.msra.gmra.mxu1 %v1693_v9  ;;  %v199_v41 = vrot.slane %v4502_v6, %v4497_v4  ;;  %v4032_v27 = vld [vmem:[#allocation3 + $0x340] ss:$8 sps:$4 sm:$0xff]  }
  0x74   :  { %3090 = vmatpush1.bf16.msra.mxu0 %v4023_v62  ;;  %v1538_v38 = vsel %vm1461_vm0, %v1537_v32, %v1337_v21  ;;  %v1547_v39 = vrot.slane %v1433_v29, 2  ;;  %v1549_v40 = vrot.slane %v1449_v30, 1  ;;  %3127 = vmatpush1.bf16.msra.mxu1 %v4014_v8  ;;  %v263_v44 = vrot.slane %v4504_v7, %v4497_v4  ;;  %v4049_v9 = vld [vmem:[#allocation3 + $0x214] ss:$8 sps:$4 sm:$0xff]  }
  0x75   :  { %3091 = vmatprep.subr.bf16.mxu0 %v4031_v2  ;;  %v1540_v43 = vsel %vm1464_vm1, %v1539_v33, %v1538_v38  ;;  %v327_v1 = vrot.slane %v4512_v12, %v4497_v4  ;;  %v391_v45 = vrot.slane %v4521_v17, %v4497_v4  ;;  %3128 = vmatprep.subr.bf16.mxu1 %v4022_v28 }
  0x76   :  { %v1542_v49 = vsel %vm1467_vm2, %v1541_v34, %v1540_v43  ;;  %v455_v50 = vrot.slane %v4529_v22, %v4497_v4  ;;  %v519_v51 = vrot.slane %v4538_v47, %v4497_v4  ;;  %v583_v53 = vrot.slane %v4541_v52, %v4497_v4 }
  0x77   :  { %v1544_v55 = vsel %vm1470_vm3, %v1543_v35, %v1542_v49  ;;  %v647_v56 = vrot.slane %v4564_v31, %v4497_v4  ;;  %v815_v59 = vpack.c.bf16 %v199_v41, %v199_v41  ;;  %v831_v10 = vpack.c.bf16 %v263_v44, %v263_v44  ;;  %v4040_v35 = vld [vmem:[#allocation3 + $0x334] ss:$8 sps:$4 sm:$0xff]   ;;  %v4055_v44 = vld [vmem:[#allocation3 + $0x204] ss:$8 sps:$4 sm:$0xff]   ;;  %v4038_v49 = vld [vmem:[#allocation3 + $0x330] ss:$8 sps:$4 sm:$0xff]  }
  0x78   :  { %3092 = vmatpush1.bf16.msra.mxu0 %v4029_v13  ;;  %v1546_v11 = vsel %vm1473_vm4, %v1545_v36, %v1544_v55  ;;  %v847_v14 = vpack.c.bf16 %v327_v1, %v327_v1  ;;  %v863_v61 = vpack.c.bf16 %v391_v45, %v391_v45  ;;  %v879_v57 = vpack.c.bf16 %v455_v50, %v455_v50  ;;  %v4046_v55 = vld [vmem:[#allocation3 + $0x324] ss:$8 sps:$4 sm:$0xff]  }
  0x79   :  { %3093 = vmatprep.subr.bf16.mxu0 %v4037_v37  ;;  %3129 = vmatpush1.bf16.msra.mxu1 %v4020_v42  ;;  %v1548_v16 = vsel %vm1476_vm5, %v1547_v39, %v1546_v11  ;;  %v895_v62 = vpack.c.bf16 %v519_v51, %v519_v51  ;;  %v911_v63 = vpack.c.bf16 %v583_v53, %v583_v53  ;;  %v1339_v2 = vunpack.c.l.b16 %v815_v59  ;;  %v4047_v39 = vld [vmem:[#allocation3 + $0x210] ss:$8 sps:$4 sm:$0xff]   ;;  %v4053_v59 = vld [vmem:[#allocation3 + $0x200] ss:$8 sps:$4 sm:$0xff]  }
  0x7a   :  { %v927_v18 = vpack.c.bf16 %v647_v56, %v647_v56  ;;  %3130 = vmatprep.subr.bf16.mxu1 %v4028_v48  ;;  %v1550_v20 = vsel %vm1479_vm6, %v1549_v40, %v1548_v16  ;;  %v1355_v21 = vunpack.c.l.b16 %v831_v10  ;;  %v1371_v3 = vunpack.c.l.b16 %v847_v14  ;;  %v4061_v14 = vld [vmem:[#allocation3 + $0x2f4] ss:$8 sps:$4 sm:$0xff]  }
  0x7b   :  { %v1696_v24 = vpack.c.b16 %v1550_v20, %v1550_v20  ;;  %v1387_v8 = vunpack.c.l.b16 %v863_v61  ;;  %v1403_v25 = vunpack.c.l.b16 %v879_v57  ;;  %v1419_v26 = vunpack.c.l.b16 %v895_v62  ;;  %v4044_v62 = vld [vmem:[#allocation3 + $0x320] ss:$8 sps:$4 sm:$0xff]  }
  0x7c   :  { %3094 = vmatpush1.bf16.msra.mxu0 %v4035_v54  ;;  %v1435_v28 = vunpack.c.l.b16 %v911_v63  ;;  %v1451_v13 = vunpack.c.l.b16 %v927_v18  ;;  %v1565_v29 = vrot.slane %v1355_v21, 7  ;;  %v1567_v30 = vrot.slane %v1371_v3, 6  ;;  %v4059_v21 = vld [vmem:[#allocation3 + $0x2f0] ss:$8 sps:$4 sm:$0xff]  }
  0x7d   :  { %3095 = vmatprep.subr.bf16.mxu0 %v4043_v60  ;;  %3131 = vmatpush1.bf16.msra.mxu1 %v4026_v15  ;;  %v1569_v32 = vrot.slane %v1387_v8, 5  ;;  %v1571_v33 = vrot.slane %v1403_v25, 4  ;;  %v187_v34 = vrot.slane %v4502_v6, %v4485_v0  ;;  %v1573_v37 = vrot.slane %v1419_v26, 3  ;;  %v4067_v8 = vld [vmem:[#allocation3 + $0x2e4] ss:$8 sps:$4 sm:$0xff]  }
  0x7e   :  { %3117 = vmatprep.mubr.bf16.mxu0 %v1696_v24  ;;  %3132 = vmatprep.subr.bf16.mxu1 %v4034_v19  ;;  %v1566_v36 = vsel %vm1461_vm0, %v1565_v29, %v1339_v2  ;;  %v251_v38 = vrot.slane %v4504_v7, %v4485_v0  ;;  %v1575_v41 = vrot.slane %v1435_v28, 2  ;;  %v315_v42 = vrot.slane %v4512_v12, %v4485_v0  ;;  %v4052_v19 = vld [vmem:[#allocation3 + $0x314] ss:$8 sps:$4 sm:$0xff]   ;;  %v4050_v28 = vld [vmem:[#allocation3 + $0x310] ss:$8 sps:$4 sm:$0xff]  }
  0x7f   :  { %v1568_v40 = vsel %vm1464_vm1, %v1567_v30, %v1566_v36  ;;  %v379_v43 = vrot.slane %v4521_v17, %v4485_v0  ;;  %v1577_v45 = vrot.slane %v1451_v13, 1  ;;  %v443_v48 = vrot.slane %v4529_v22, %v4485_v0 }
  0x80   :  { %3096 = vmatpush1.bf16.msra.mxu0 %v4041_v23  ;;  %v1570_v1 = vsel %vm1467_vm2, %v1569_v32, %v1568_v40  ;;  %v812_v51 = vpack.c.bf16 %v187_v34, %v187_v34  ;;  %v828_v53 = vpack.c.bf16 %v251_v38, %v251_v38  ;;  %v844_v54 = vpack.c.bf16 %v315_v42, %v315_v42  ;;  %v4058_v32 = vld [vmem:[#allocation3 + $0x304] ss:$8 sps:$4 sm:$0xff]   ;;  %v4065_v34 = vld [vmem:[#allocation3 + $0x2e0] ss:$8 sps:$4 sm:$0xff]  }
  0x81   :  { %3097 = vmatprep.subr.bf16.mxu0 %v4049_v9  ;;  %3133 = vmatpush1.bf16.msra.mxu1 %v4032_v27  ;;  %v1572_v50 = vsel %vm1470_vm3, %v1571_v33, %v1570_v1  ;;  %v507_v60 = vrot.slane %v4538_v47, %v4485_v0  ;;  %v860_v11 = vpack.c.bf16 %v379_v43, %v379_v43  ;;  %v4056_v40 = vld [vmem:[#allocation3 + $0x300] ss:$8 sps:$4 sm:$0xff]   ;;  %v4064_v1 = vld [vmem:[#allocation3 + $0x3f4] ss:$8 sps:$4 sm:$0xff]  }
  0x82   :  { %3134 = vmatprep.subr.bf16.mxu1 %v4040_v35  ;;  %v1574_v56 = vsel %vm1473_vm4, %v1573_v37, %v1572_v50  ;;  %v876_v57 = vpack.c.bf16 %v443_v48, %v443_v48  ;;  %v1352_v15 = vunpack.c.l.b16 %v828_v53  ;;  %v1368_v16 = vunpack.c.l.b16 %v844_v54 }
  0x83   :  { %v1576_v10 = vsel %vm1476_vm5, %v1575_v41, %v1574_v56  ;;  %v1336_v18 = vunpack.c.l.b16 %v812_v51  ;;  %v571_v20 = vrot.slane %v4541_v52, %v4485_v0  ;;  %v892_v3 = vpack.c.bf16 %v507_v60, %v507_v60  ;;  %v4071_v51 = vld [vmem:[#allocation3 + $0x2d0] ss:$8 sps:$4 sm:$0xff]   ;;  %v4079_v56 = vld [vmem:[#allocation3 + $0x2c4] ss:$8 sps:$4 sm:$0xff]  }
  0x84   :  { %3098 = vmatpush1.bf16.msra.mxu0 %v4047_v39  ;;  %v1578_v61 = vsel %vm1479_vm6, %v1577_v45, %v1576_v10  ;;  %v1523_v2 = vrot.slane %v1352_v15, 7  ;;  %v1384_v23 = vunpack.c.l.b16 %v860_v11  ;;  %v195_v24 = vrot.slane %v4502_v6, %v4500_v5  ;;  %v4070_v15 = vld [vmem:[#allocation3 + $0x3e4] ss:$8 sps:$4 sm:$0xff]  }
  0x85   :  { %3099 = vmatprep.subr.bf16.mxu0 %v4055_v44  ;;  %3135 = vmatpush1.bf16.msra.mxu1 %v4038_v49  ;;  %v1698_v63 = vpack.c.b16 %v1578_v61, %v1578_v61  ;;  %v1400_v25 = vunpack.c.l.b16 %v876_v57  ;;  %v1525_v26 = vrot.slane %v1368_v16, 6  ;;  %v259_v27 = vrot.slane %v4504_v7, %v4500_v5 }
  0x86   :  { %3136 = vmatprep.subr.bf16.mxu1 %v4046_v55  ;;  %v323_v9 = vrot.slane %v4512_v12, %v4500_v5  ;;  %v1524_v13 = vsel %vm1461_vm0, %v1523_v2, %v1336_v18  ;;  %v387_v29 = vrot.slane %v4521_v17, %v4500_v5  ;;  %v451_v6 = vrot.slane %v4529_v22, %v4500_v5  ;;  %v4073_v17 = vld [vmem:[#allocation3 + $0x2d4] ss:$8 sps:$4 sm:$0xff]   ;;  %v4077_v18 = vld [vmem:[#allocation3 + $0x2c0] ss:$8 sps:$4 sm:$0xff]  }
  0x87   :  { %3158 = vmatprep.mubr.bf16.mxu1 %v1698_v63  ;;  %v515_v30 = vrot.slane %v4538_v47, %v4500_v5  ;;  %v635_v7 = vrot.slane %v4564_v31, %v4485_v0  ;;  %v908_v33 = vpack.c.bf16 %v571_v20, %v571_v20  ;;  %v814_v12 = vpack.c.bf16 %v195_v24, %v195_v24  ;;  %v4085_v2 = vld [vmem:[#allocation3 + $0x2b4] ss:$8 sps:$4 sm:$0xff]   ;;  %v4068_v24 = vld [vmem:[#allocation3 + $0x3e0] ss:$8 sps:$4 sm:$0xff]  }
  0x88   :  { %3100 = vmatpush1.bf16.msra.mxu0 %v4053_v59  ;;  %v1527_v35 = vrot.slane %v1384_v23, 5  ;;  %v830_v36 = vpack.c.bf16 %v259_v27, %v259_v27  ;;  %v846_v37 = vpack.c.bf16 %v323_v9, %v323_v9  ;;  %v862_v38 = vpack.c.bf16 %v387_v29, %v387_v29  ;;  %v4083_v9 = vld [vmem:[#allocation3 + $0x2b0] ss:$8 sps:$4 sm:$0xff]   ;;  %v4091_v29 = vld [vmem:[#allocation3 + $0x2a4] ss:$8 sps:$4 sm:$0xff]  }
  0x89   :  { %3101 = vmatprep.subr.bf16.mxu0 %v4061_v14  ;;  %3137 = vmatpush1.bf16.msra.mxu1 %v4044_v62  ;;  %v1526_v22 = vsel %vm1464_vm1, %v1525_v26, %v1524_v13  ;;  %v579_v47 = vrot.slane %v4541_v52, %v4500_v5  ;;  %v878_v39 = vpack.c.bf16 %v451_v6, %v451_v6  ;;  %v1416_v41 = vunpack.c.l.b16 %v892_v3  ;;  %v4062_v14 = vld [vmem:[#allocation3 + $0x3f0] ss:$8 sps:$4 sm:$0xff]   ;;  %v4076_v26 = vld [vmem:[#allocation3 + $0x3d4] ss:$8 sps:$4 sm:$0xff]  }
  0x8a   :  { %3138 = vmatprep.subr.bf16.mxu1 %v4052_v19  ;;  %v1529_v42 = vrot.slane %v1400_v25, 4  ;;  %v894_v43 = vpack.c.bf16 %v515_v30, %v515_v30  ;;  %v1354_v44 = vunpack.c.l.b16 %v830_v36  ;;  %v1338_v45 = vunpack.c.l.b16 %v814_v12  ;;  %v4080_v12 = vld [vmem:[#allocation3 + $0x3c0] ss:$8 sps:$4 sm:$0xff]  }
  0x8b   :  { %v1370_v48 = vunpack.c.l.b16 %v846_v37  ;;  %v1386_v49 = vunpack.c.l.b16 %v862_v38  ;;  %v1402_v50 = vunpack.c.l.b16 %v878_v39  ;;  %v924_v53 = vpack.c.bf16 %v635_v7, %v635_v7  ;;  %v4097_v37 = vld [vmem:[#allocation3 + $0x294] ss:$8 sps:$4 sm:$0xff]   ;;  %v4103_v39 = vld [vmem:[#allocation3 + $0x284] ss:$8 sps:$4 sm:$0xff]  }
  0x8c   :  { %3102 = vmatpush2.bf16.msra.mxu0 %v4059_v21  ;;  %v1432_v54 = vunpack.c.l.b16 %v908_v33  ;;  %v1528_v55 = vsel %vm1467_vm2, %v1527_v35, %v1526_v22  ;;  %v643_v52 = vrot.slane %v4564_v31, %v4500_v5  ;;  %v910_v59 = vpack.c.bf16 %v579_v47, %v579_v47  ;;  %v4082_v33 = vld [vmem:[#allocation3 + $0x3c4] ss:$8 sps:$4 sm:$0xff]   ;;  %v4095_v22 = vld [vmem:[#allocation3 + $0x290] ss:$8 sps:$4 sm:$0xff]  }
  0x8d   :  { %3103 = vmatprep.subr.bf16.mxu0 %v4067_v8  ;;  %3139 = vmatpush1.bf16.msra.mxu1 %v4050_v28  ;;  %v1551_v10 = vrot.slane %v1354_v44, 7  ;;  %v1553_v60 = vrot.slane %v1370_v48, 6  ;;  %v1555_v11 = vrot.slane %v1386_v49, 5  ;;  %v1531_v61 = vrot.slane %v1416_v41, 3  ;;  %v4718_v47 = vld [vmem:[%s5060_s0 + $0x8] sm:$0xff]  ;;  %v4725_v41 = vld [vmem:[%s5060_s0 + $0x18] sm:$0xff] }
  0x8e   :  { %3140 = vmatprep.subr.bf16.mxu1 %v4058_v32  ;;  %v1418_v57 = vunpack.c.l.b16 %v894_v43  ;;  %v1530_v16 = vsel %vm1470_vm3, %v1529_v42, %v1528_v55  ;;  %v1557_v63 = vrot.slane %v1402_v50, 4  ;;  %v1448_v31 = vunpack.c.l.b16 %v924_v53  ;;  %v4074_v32 = vld [vmem:[#allocation3 + $0x3d0] ss:$8 sps:$4 sm:$0xff]   ;;  %v4730_v42 = vld [vmem:[%s5060_s0 + $0x28] sm:$0xff] }
  0x8f   :  { %v1552_v62 = vsel %vm1461_vm0, %v1551_v10, %v1338_v45  ;;  %v926_v19 = vpack.c.bf16 %v643_v52, %v643_v52  ;;  %v1533_v21 = vrot.slane %v1432_v54, 2  ;;  %v1434_v3 = vunpack.c.l.b16 %v910_v59  ;;  %v4735_v43 = vld [vmem:[%s5060_s0 + $0x38] sm:$0xff]  ;;  %v4746_v45 = vld [vmem:[%s5060_s0 + $0x48] sm:$0xff] }
  0x90   :  { %3104 = vmatpush2.bf16.msra.mxu0 %v4065_v34  ;;  %v1554_v20 = vsel %vm1464_vm1, %v1553_v60, %v1552_v62  ;;  %v1532_v8 = vsel %vm1473_vm4, %v1531_v61, %v1530_v16  ;;  %v1559_v25 = vrot.slane %v1418_v57, 3  ;;  %v1535_v28 = vrot.slane %v1448_v31, 1  ;;  %v4089_v34 = vld [vmem:[#allocation3 + $0x2a0] ss:$8 sps:$4 sm:$0xff]   ;;  %v4751_v48 = vld [vmem:[%s5060_s0 + $0x58] sm:$0xff] }
  0x91   :  { %3105 = vmatprep.subr.bf16.mxu0 %v4073_v17  ;;  %3141 = vmatpush1.bf16.msra.mxu1 %v4056_v40  ;;  %v1556_v23 = vsel %vm1467_vm2, %v1555_v11, %v1554_v20  ;;  %v1450_v13 = vunpack.c.l.b16 %v926_v19  ;;  %v1534_v6 = vsel %vm1476_vm5, %v1533_v21, %v1532_v8  ;;  %v1561_v30 = vrot.slane %v1434_v3, 2  ;;  %v4088_v17 = vld [vmem:[#allocation3 + $0x3b4] ss:$8 sps:$4 sm:$0xff]   ;;  %v4756_v49 = vld [vmem:[%s5060_s0 + $0x68] sm:$0xff]  ;;  %v4086_v10 = vld [vmem:[#allocation3 + $0x3b0] ss:$8 sps:$4 sm:$0xff]  }
  0x92   :  { %3142 = vmatprep.subr.bf16.mxu1 %v4064_v1  ;;  %v1558_v27 = vsel %vm1470_vm3, %v1557_v63, %v1556_v23  ;;  %v4712_v35 = vsel %vm1479_vm6, %v1535_v28, %v1534_v6  ;;  %v4738_v44 = vunpack.c.l.bf16 %v4718_v47  ;;  %v4759_v50 = vunpack.c.l.bf16 %v4725_v41  ;;  %v4770_v54 = vld [vmem:[%s5060_s0 + $0x78] sm:$0xff]  ;;  %v4094_v57 = vld [vmem:[#allocation3 + $0x3a4] ss:$8 sps:$4 sm:$0xff]  }
  0x93   :  { %v1560_v7 = vsel %vm1473_vm4, %v1559_v25, %v1558_v27  ;;  %v1563_v36 = vrot.slane %v1450_v13, 1  ;;  %v1695_v40 = vpack.c.b16 %v4712_v35, %v4712_v35  ;;  %v4765_v53 = vunpack.c.l.bf16 %v4735_v43  ;;  %v4109_v21 = vld [vmem:[#allocation3 + $0x474] ss:$8 sps:$4 sm:$0xff]   ;;  %v4092_v25 = vld [vmem:[#allocation3 + $0x3a0] ss:$8 sps:$4 sm:$0xff]  }
  0x94   :  { %3106 = vmatpush2.bf16.msra.mxu0 %v4071_v51  ;;  %v1562_v38 = vsel %vm1476_vm5, %v1561_v30, %v1560_v7  ;;  %v4762_v51 = vunpack.c.l.bf16 %v4730_v42  ;;  %v4773_v55 = vunpack.c.l.bf16 %v4746_v45  ;;  %v4776_v52 = vunpack.c.l.bf16 %v4751_v48  ;;  %v4100_v13 = vld [vmem:[#allocation3 + $0x394] ss:$8 sps:$4 sm:$0xff]  }
  0x95   :  { %3107 = vmatprep.subr.bf16.mxu0 %v4079_v56  ;;  %3143 = vmatpush2.bf16.msra.mxu1 %v4062_v14  ;;  %v4741_v1 = vsel %vm1479_vm6, %v1563_v36, %v1562_v38  ;;  %v4779_v56 = vunpack.c.l.bf16 %v4756_v49  ;;  %v207_v59 = vrot.slane %v4738_v44, %v4465_v58  ;;  %v4784_v60 = vunpack.c.l.bf16 %v4770_v54  ;;  %v4115_v38 = vld [vmem:[#allocation3 + $0x464] ss:$8 sps:$4 sm:$0xff]  }
  0x96   :  { %3144 = vmatprep.subr.bf16.mxu1 %v4070_v15  ;;  %v271_v11 = vrot.slane %v4759_v50, %v4465_v58  ;;  %v335_v14 = vrot.slane %v4762_v51, %v4465_v58  ;;  %v399_v61 = vrot.slane %v4765_v53, %v4465_v58  ;;  %v463_v15 = vrot.slane %v4773_v55, %v4465_v58 }
  0x97   :  { %v527_v16 = vrot.slane %v4776_v52, %v4465_v58  ;;  %v591_v62 = vrot.slane %v4779_v56, %v4465_v58  ;;  %v817_v63 = vpack.c.bf16 %v207_v59, %v207_v59  ;;  %v655_v31 = vrot.slane %v4784_v60, %v4465_v58  ;;  %v4098_v59 = vld [vmem:[#allocation3 + $0x390] ss:$8 sps:$4 sm:$0xff]  }
  0x98   :  { %3108 = vmatpush2.bf16.msra.mxu0 %v4077_v18  ;;  %v4101_v18 = vld [vmem:[#allocation3 + $0x280] ss:$8 sps:$4 sm:$0xff]   ;;  %v833_v19 = vpack.c.bf16 %v271_v11, %v271_v11  ;;  %v849_v20 = vpack.c.bf16 %v335_v14, %v335_v14  ;;  %v881_v3 = vpack.c.bf16 %v463_v15, %v463_v15  ;;  %v215_v7 = vrot.slane %v4738_v44, %v4497_v4 }
  0x99   :  { %3109 = vmatprep.subr.bf16.mxu0 %v4085_v2  ;;  %3145 = vmatpush2.bf16.msra.mxu1 %v4068_v24  ;;  %v865_v2 = vpack.c.bf16 %v399_v61, %v399_v61  ;;  %v897_v23 = vpack.c.bf16 %v527_v16, %v527_v16  ;;  %v913_v24 = vpack.c.bf16 %v591_v62, %v591_v62  ;;  %v1341_v8 = vunpack.c.l.b16 %v817_v63 }
  0x9a   :  { %3146 = vmatprep.subr.bf16.mxu1 %v4076_v26  ;;  %v929_v26 = vpack.c.bf16 %v655_v31, %v655_v31  ;;  %v1357_v27 = vunpack.c.l.b16 %v833_v19  ;;  %v1405_v6 = vunpack.c.l.b16 %v881_v3  ;;  %v343_v14 = vrot.slane %v4762_v51, %v4497_v4 }
  0x9b   :  { %v1389_v28 = vunpack.c.l.b16 %v865_v2  ;;  %v1421_v30 = vunpack.c.l.b16 %v897_v23  ;;  %v407_v61 = vrot.slane %v4765_v53, %v4497_v4  ;;  %v471_v62 = vrot.slane %v4773_v55, %v4497_v4 }
  0x9c   :  { %3110 = vmatpush2.bf16.msra.mxu0 %v4083_v9  ;;  %v1373_v9 = vunpack.c.l.b16 %v849_v20  ;;  %v535_v63 = vrot.slane %v4776_v52, %v4497_v4  ;;  %v599_v19 = vrot.slane %v4779_v56, %v4497_v4  ;;  %v663_v35 = vrot.slane %v4784_v60, %v4497_v4  ;;  %v4121_v20 = vld [vmem:[#allocation3 + $0x454] ss:$8 sps:$4 sm:$0xff]  }
  0x9d   :  { %3111 = vmatprep.subr.bf16.mxu0 %v4091_v29  ;;  %3147 = vmatpush2.bf16.msra.mxu1 %v4074_v32  ;;  %v4107_v29 = vld [vmem:[#allocation3 + $0x470] ss:$8 sps:$4 sm:$0xff]   ;;  %v1437_v32 = vunpack.c.l.b16 %v913_v24  ;;  %v1597_v36 = vrot.slane %v1389_v28, 5  ;;  %v851_v3 = vpack.c.bf16 %v343_v14, %v343_v14  ;;  %v867_v23 = vpack.c.bf16 %v407_v61, %v407_v61  ;;  %v4104_v24 = vld [vmem:[#allocation3 + $0x380] ss:$8 sps:$4 sm:$0xff]  }
  0x9e   :  { %3148 = vmatprep.subr.bf16.mxu1 %v4082_v33  ;;  %v1453_v33 = vunpack.c.l.b16 %v929_v26  ;;  %v899_v26 = vpack.c.bf16 %v535_v63, %v535_v63  ;;  %v4118_v14 = vld [vmem:[#allocation3 + $0x564] ss:$8 sps:$4 sm:$0xff]  }
  0x9f   :  { %v1603_v11 = vrot.slane %v1437_v32, 2 }
  0xa0   :  { %3112 = vmatpush2.bf16.msra.mxu0 %v4089_v34  ;;  %v1595_v34 = vrot.slane %v1373_v9, 6  ;;  %v1605_v16 = vrot.slane %v1453_v33, 1  ;;  %v4112_v9 = vld [vmem:[#allocation3 + $0x574] ss:$8 sps:$4 sm:$0xff]   ;;  %v1391_v33 = vunpack.c.l.b16 %v867_v23 }
  0xa1   :  { %3113 = vmatprep.subr.bf16.mxu0 %v4097_v37  ;;  %3149 = vmatpush2.bf16.msra.mxu1 %v4080_v12  ;;  %v1593_v12 = vrot.slane %v1357_v27, 7  ;;  %v1697_v37 = vpack.c.b16 %v4741_v1, %v4741_v1  ;;  %v915_v27 = vpack.c.bf16 %v599_v19, %v599_v19  ;;  %v395_v19 = vrot.slane %v4765_v53, %v4485_v0 }
  0xa2   :  { %3150 = vmatprep.subr.bf16.mxu1 %v4088_v17  ;;  %v1599_v17 = vrot.slane %v1405_v6, 4  ;;  %v651_v1 = vrot.slane %v4784_v60, %v4485_v0 }
  0xa4   :  { %3114 = vmatpush2.bf16.msra.mxu0 %v4095_v22  ;;  %v1601_v22 = vrot.slane %v1421_v30, 3  ;;  %v4119_v30 = vld [vmem:[#allocation3 + $0x450] ss:$8 sps:$4 sm:$0xff]  }
  0xa5   :  { %3115 = vmatprep.subr.bf16.mxu0 %v4103_v39  ;;  %3151 = vmatpush2.bf16.msra.mxu1 %v4086_v10  ;;  %v279_v39 = vrot.slane %v4759_v50, %v4497_v4  ;;  %v1594_v10 = vsel %vm1461_vm0, %v1593_v12, %v1341_v8 }
  0xa6   :  { %3152 = vmatprep.subr.bf16.mxu1 %v4094_v57  ;;  %v4106_v57 = vld [vmem:[#allocation3 + $0x384] ss:$8 sps:$4 sm:$0xff]   ;;  %v1596_v15 = vsel %vm1464_vm1, %v1595_v34, %v1594_v10  ;;  %v4110_v34 = vld [vmem:[#allocation3 + $0x570] ss:$8 sps:$4 sm:$0xff]  }
  0xa7   :  { %v1598_v31 = vsel %vm1467_vm2, %v1597_v36, %v1596_v15  ;;  %v4127_v36 = vld [vmem:[#allocation3 + $0x444] ss:$8 sps:$4 sm:$0xff]  }
  0xa8   :  { %3116 = vmatpush2.bf16.msra.mxu0 %v4101_v18  ;;  %v4113_v18 = vld [vmem:[#allocation3 + $0x460] ss:$8 sps:$4 sm:$0xff]   ;;  %v1600_v2 = vsel %vm1470_vm3, %v1599_v17, %v1598_v31  ;;  %v1423_v17 = vunpack.c.l.b16 %v899_v26  ;;  %v331_v31 = vrot.slane %v4762_v51, %v4485_v0 }
  0xa9   :  { %3167 = vmatprep.subr.bf16.mxu0 %v4109_v21  ;;  %3153 = vmatpush2.bf16.msra.mxu1 %v4092_v25  ;;  %v835_v21 = vpack.c.bf16 %v279_v39, %v279_v39  ;;  %v1602_v8 = vsel %vm1473_vm4, %v1601_v22, %v1600_v2  ;;  %v883_v25 = vpack.c.bf16 %v471_v62, %v471_v62  ;;  %v1439_v22 = vunpack.c.l.b16 %v915_v27  ;;  %v4125_v62 = vld [vmem:[#allocation3 + $0x440] ss:$8 sps:$4 sm:$0xff]  }
  0xaa   :  { %3154 = vmatprep.subr.bf16.mxu1 %v4100_v13  ;;  %v1604_v28 = vsel %vm1476_vm5, %v1603_v11, %v1602_v8  ;;  %v931_v13 = vpack.c.bf16 %v663_v35, %v663_v35  ;;  %v1625_v11 = vrot.slane %v1391_v33, 5  ;;  %v4133_v35 = vld [vmem:[#allocation3 + $0x434] ss:$8 sps:$4 sm:$0xff]   ;;  %v459_v2 = vrot.slane %v4773_v55, %v4485_v0 }
  0xab   :  { %3118 = vmatmul.mubr.bf16.vlgmr.msra.gmra.mxu0 %v1695_v40  ;;  %v819_v40 = vpack.c.bf16 %v215_v7, %v215_v7  ;;  %v1359_v6 = vunpack.c.l.b16 %v835_v21  ;;  %v1606_v32 = vsel %vm1479_vm6, %v1605_v16, %v1604_v28  ;;  %v1375_v7 = vunpack.c.l.b16 %v851_v3  ;;  %v4116_v3 = vld [vmem:[#allocation3 + $0x560] ss:$8 sps:$4 sm:$0xff]   ;;  %v4124_v8 = vld [vmem:[#allocation3 + $0x554] ss:$8 sps:$4 sm:$0xff]   ;;  %v4131_v28 = vld [vmem:[#allocation3 + $0x430] ss:$8 sps:$4 sm:$0xff]  }
  0xac   :  { %3168 = vmatpush1.bf16.msra.mxu0 %v4107_v29  ;;  %v1407_v12 = vunpack.c.l.b16 %v883_v25  ;;  %v1455_v39 = vunpack.c.l.b16 %v931_v13  ;;  %v1631_v15 = vrot.slane %v1439_v22, 2  ;;  %v203_v16 = vrot.slane %v4738_v44, %v4485_v0 }
  0xad   :  { %3169 = vmatprep.subr.bf16.mxu0 %v4115_v38  ;;  %3155 = vmatpush2.bf16.msra.mxu1 %v4098_v59  ;;  %v1343_v29 = vunpack.c.l.b16 %v819_v40  ;;  %v1700_v38 = vpack.c.b16 %v1606_v32, %v1606_v32  ;;  %v1621_v59 = vrot.slane %v1359_v6, 7  ;;  %v1623_v10 = vrot.slane %v1375_v7, 6  ;;  %v4139_v32 = vld [vmem:[#allocation3 + $0x424] ss:$8 sps:$4 sm:$0xff]  }
  0xae   :  { %3156 = vmatprep.subr.bf16.mxu1 %v4106_v57  ;;  %v1627_v61 = vrot.slane %v1407_v12, 4  ;;  %v1629_v57 = vrot.slane %v1423_v17, 3  ;;  %v523_v21 = vrot.slane %v4776_v52, %v4485_v0  ;;  %v848_v27 = vpack.c.bf16 %v331_v31, %v331_v31 }
  0xaf   :  { %3199 = vmatprep.mubr.bf16.mxu0 %v1700_v38  ;;  %v1622_v63 = vsel %vm1461_vm0, %v1621_v59, %v1343_v29  ;;  %v880_v29 = vpack.c.bf16 %v459_v2, %v459_v2  ;;  %v928_v33 = vpack.c.bf16 %v651_v1, %v651_v1  ;;  %v4130_v59 = vld [vmem:[#allocation3 + $0x544] ss:$8 sps:$4 sm:$0xff]   ;;  %v275_v2 = vrot.slane %v4759_v50, %v4500_v5 }
  0xb0   :  { %3170 = vmatpush1.bf16.msra.mxu0 %v4113_v18  ;;  %v267_v18 = vrot.slane %v4759_v50, %v4485_v0  ;;  %v1624_v40 = vsel %vm1464_vm1, %v1623_v10, %v1622_v63  ;;  %v896_v6 = vpack.c.bf16 %v523_v21, %v523_v21  ;;  %v1372_v17 = vunpack.c.l.b16 %v848_v27  ;;  %v4137_v10 = vld [vmem:[#allocation3 + $0x420] ss:$8 sps:$4 sm:$0xff]   ;;  %v4143_v50 = vld [vmem:[#allocation3 + $0x410] ss:$8 sps:$4 sm:$0xff]  }
  0xb1   :  { %3171 = vmatprep.subr.bf16.mxu0 %v4121_v20  ;;  %3157 = vmatpush2.bf16.msra.mxu1 %v4104_v24  ;;  %v1633_v20 = vrot.slane %v1455_v39, 1  ;;  %v1626_v23 = vsel %vm1467_vm2, %v1625_v11, %v1624_v40  ;;  %v587_v24 = vrot.slane %v4779_v56, %v4485_v0  ;;  %v1404_v39 = vunpack.c.l.b16 %v880_v29 }
  0xb2   :  { %3208 = vmatprep.subr.bf16.mxu1 %v4112_v9  ;;  %v1628_v25 = vsel %vm1470_vm3, %v1627_v61, %v1626_v23  ;;  %v832_v26 = vpack.c.bf16 %v267_v18, %v267_v18  ;;  %v864_v9 = vpack.c.bf16 %v395_v19, %v395_v19  ;;  %v4145_v18 = vld [vmem:[#allocation3 + $0x414] ss:$8 sps:$4 sm:$0xff]   ;;  %v211_v40 = vrot.slane %v4738_v44, %v4500_v5 }
  0xb3   :  { %v1630_v13 = vsel %vm1473_vm4, %v1629_v57, %v1628_v25  ;;  %v4855_v57 = vunpack.c.h.bf16 %v4718_v47  ;;  %v1585_v31 = vrot.slane %v1404_v39, 4  ;;  %v339_v21 = vrot.slane %v4762_v51, %v4500_v5  ;;  %v4136_v23 = vld [vmem:[#allocation3 + $0x534] ss:$8 sps:$4 sm:$0xff]  }
  0xb4   :  { %3172 = vmatpush1.bf16.msra.mxu0 %v4119_v30  ;;  %3159 = vmatmul.mubr.bf16.vlgmr.msra.gmra.mxu1 %v1697_v37  ;;  %v816_v37 = vpack.c.bf16 %v203_v16, %v203_v16  ;;  %v912_v30 = vpack.c.bf16 %v587_v24, %v587_v24  ;;  %v1632_v7 = vsel %vm1476_vm5, %v1631_v15, %v1630_v13  ;;  %v1388_v22 = vunpack.c.l.b16 %v864_v9  ;;  %v4157_v39 = vld [vmem:[#allocation3 + $0x4f4] ss:$8 sps:$4 sm:$0xff]  }
  0xb5   :  { %3173 = vmatprep.subr.bf16.mxu0 %v4127_v36  ;;  %3209 = vmatpush1.bf16.msra.mxu1 %v4110_v34  ;;  %v1356_v34 = vunpack.c.l.b16 %v832_v26  ;;  %v4122_v36 = vld [vmem:[#allocation3 + $0x550] ss:$8 sps:$4 sm:$0xff]   ;;  %v1634_v38 = vsel %vm1479_vm6, %v1633_v20, %v1632_v7  ;;  %v4857_v15 = vunpack.c.l.b16 %v928_v33  ;;  %v4128_v20 = vld [vmem:[#allocation3 + $0x540] ss:$8 sps:$4 sm:$0xff]   ;;  %v467_v44 = vrot.slane %v4773_v55, %v4500_v5  ;;  %v4151_v26 = vld [vmem:[#allocation3 + $0x404] ss:$8 sps:$4 sm:$0xff]  }
  0xb6   :  { %3210 = vmatprep.subr.bf16.mxu1 %v4118_v14  ;;  %v1340_v12 = vunpack.c.l.b16 %v816_v37  ;;  %v1702_v11 = vpack.c.b16 %v1634_v38, %v1634_v38  ;;  %v1420_v14 = vunpack.c.l.b16 %v896_v6  ;;  %v1436_v61 = vunpack.c.l.b16 %v912_v30  ;;  %v4142_v30 = vld [vmem:[#allocation3 + $0x524] ss:$8 sps:$4 sm:$0xff]  }
  0xb7   :  { %v1579_v16 = vrot.slane %v1356_v34, 7  ;;  %v1583_v63 = vrot.slane %v1388_v22, 5  ;;  %v531_v1 = vrot.slane %v4776_v52, %v4500_v5  ;;  %v595_v37 = vrot.slane %v4779_v56, %v4500_v5  ;;  %v4134_v52 = vld [vmem:[#allocation3 + $0x530] ss:$8 sps:$4 sm:$0xff]   ;;  %v4140_v22 = vld [vmem:[#allocation3 + $0x520] ss:$8 sps:$4 sm:$0xff]  }
  0xb8   :  { %3174 = vmatpush1.bf16.msra.mxu0 %v4125_v62  ;;  %v1581_v62 = vrot.slane %v1372_v17, 6  ;;  %3240 = vmatprep.mubr.bf16.mxu1 %v1702_v11  ;;  %v1587_v19 = vrot.slane %v1420_v14, 3  ;;  %v834_v25 = vpack.c.bf16 %v275_v2, %v275_v2  ;;  %v850_v55 = vpack.c.bf16 %v339_v21, %v339_v21 }
  0xb9   :  { %3175 = vmatprep.subr.bf16.mxu0 %v4133_v35  ;;  %3211 = vmatpush1.bf16.msra.mxu1 %v4116_v3  ;;  %v1589_v35 = vrot.slane %v1436_v61, 2  ;;  %v1580_v47 = vsel %vm1461_vm0, %v1579_v16, %v1340_v12  ;;  %v403_v3 = vrot.slane %v4765_v53, %v4500_v5  ;;  %v659_v53 = vrot.slane %v4784_v60, %v4500_v5  ;;  %v4149_v12 = vld [vmem:[#allocation3 + $0x400] ss:$8 sps:$4 sm:$0xff]  }
  0xba   :  { %3212 = vmatprep.subr.bf16.mxu1 %v4124_v8  ;;  %v1582_v24 = vsel %vm1464_vm1, %v1581_v62, %v1580_v47  ;;  %v818_v8 = vpack.c.bf16 %v211_v40, %v211_v40  ;;  %v898_v13 = vpack.c.bf16 %v531_v1, %v531_v1  ;;  %v914_v29 = vpack.c.bf16 %v595_v37, %v595_v37  ;;  %v4154_v37 = vld [vmem:[#allocation3 + $0x504] ss:$8 sps:$4 sm:$0xff]  }
  0xbb   :  { %v1584_v51 = vsel %vm1467_vm2, %v1583_v63, %v1582_v24  ;;  %v866_v9 = vpack.c.bf16 %v403_v3, %v403_v3  ;;  %v930_v6 = vpack.c.bf16 %v659_v53, %v659_v53  ;;  %v1358_v60 = vunpack.c.l.b16 %v834_v25  ;;  %v4148_v63 = vld [vmem:[#allocation3 + $0x514] ss:$8 sps:$4 sm:$0xff]   ;;  %v4163_v3 = vld [vmem:[#allocation3 + $0x4e4] ss:$8 sps:$4 sm:$0xff]   ;;  %v4161_v25 = vld [vmem:[#allocation3 + $0x4e0] ss:$8 sps:$4 sm:$0xff]  }
  0xbc   :  { %3176 = vmatpush1.bf16.msra.mxu0 %v4131_v28  ;;  %v1586_v27 = vsel %vm1470_vm3, %v1585_v31, %v1584_v51  ;;  %v882_v28 = vpack.c.bf16 %v467_v44, %v467_v44  ;;  %v1374_v7 = vunpack.c.l.b16 %v850_v55  ;;  %v4881_v33 = vunpack.c.h.bf16 %v4725_v41  ;;  %v4146_v44 = vld [vmem:[#allocation3 + $0x510] ss:$8 sps:$4 sm:$0xff]  }
  0xbd   :  { %3177 = vmatprep.subr.bf16.mxu0 %v4139_v32  ;;  %3213 = vmatpush1.bf16.msra.mxu1 %v4122_v36  ;;  %v1588_v56 = vsel %vm1473_vm4, %v1587_v19, %v1586_v27  ;;  %v1342_v32 = vunpack.c.l.b16 %v818_v8  ;;  %v1591_v34 = vrot.slane %v4857_v15, 1  ;;  %v1390_v36 = vunpack.c.l.b16 %v866_v9  ;;  %v4152_v8 = vld [vmem:[#allocation3 + $0x500] ss:$8 sps:$4 sm:$0xff]  }
  0xbe   :  { %3214 = vmatprep.subr.bf16.mxu1 %v4130_v59  ;;  %v1406_v38 = vunpack.c.l.b16 %v882_v28  ;;  %v1422_v17 = vunpack.c.l.b16 %v898_v13  ;;  %v1590_v59 = vsel %vm1476_vm5, %v1589_v35, %v1588_v56  ;;  %v1454_v11 = vunpack.c.l.b16 %v930_v6  ;;  %v4169_v28 = vld [vmem:[#allocation3 + $0x4d4] ss:$8 sps:$4 sm:$0xff]  }
  0xbf   :  { %v1607_v14 = vrot.slane %v1358_v60, 7  ;;  %v1609_v61 = vrot.slane %v1374_v7, 6  ;;  %v1611_v16 = vrot.slane %v1390_v36, 5  ;;  %v4887_v40 = vunpack.c.h.bf16 %v4730_v42  ;;  %v4160_v6 = vld [vmem:[#allocation3 + $0x5f4] ss:$8 sps:$4 sm:$0xff]  }
  0xc0   :  { %3178 = vmatpush1.bf16.msra.mxu0 %v4137_v10  ;;  %v1438_v10 = vunpack.c.l.b16 %v914_v29  ;;  %v1613_v41 = vrot.slane %v1406_v38, 4  ;;  %v1615_v62 = vrot.slane %v1422_v17, 3  ;;  %v1619_v19 = vrot.slane %v1454_v11, 1 }
  0xc1   :  { %3179 = vmatprep.subr.bf16.mxu0 %v4145_v18  ;;  %3215 = vmatpush1.bf16.msra.mxu1 %v4128_v20  ;;  %v1608_v18 = vsel %vm1461_vm0, %v1607_v14, %v1342_v32  ;;  %v4155_v20 = vld [vmem:[#allocation3 + $0x4f0] ss:$8 sps:$4 sm:$0xff]   ;;  %v4891_v47 = vunpack.c.h.bf16 %v4735_v43  ;;  %v4894_v2 = vunpack.c.h.bf16 %v4746_v45  ;;  %v4897_v21 = vunpack.c.h.bf16 %v4751_v48 }
  0xc2   :  { %3216 = vmatprep.subr.bf16.mxu1 %v4136_v23  ;;  %v1617_v31 = vrot.slane %v1438_v10, 2  ;;  %v1610_v35 = vsel %vm1464_vm1, %v1609_v61, %v1608_v18  ;;  %v4901_v42 = vunpack.c.h.bf16 %v4756_v49  ;;  %v4904_v24 = vunpack.c.h.bf16 %v4770_v54 }
  0xc3   :  { %v1612_v23 = vsel %vm1467_vm2, %v1611_v16, %v1610_v35  ;;  %v223_v43 = vrot.slane %v4855_v57, %v4465_v58  ;;  %v287_v48 = vrot.slane %v4881_v33, %v4465_v58  ;;  %v351_v1 = vrot.slane %v4887_v40, %v4465_v58  ;;  %v4166_v16 = vld [vmem:[#allocation3 + $0x5e4] ss:$8 sps:$4 sm:$0xff]  }
  0xc4   :  { %3180 = vmatpush1.bf16.msra.mxu0 %v4143_v50  ;;  %v1614_v45 = vsel %vm1470_vm3, %v1613_v41, %v1612_v23  ;;  %v415_v49 = vrot.slane %v4891_v47, %v4465_v58  ;;  %v479_v50 = vrot.slane %v4894_v2, %v4465_v58  ;;  %v543_v51 = vrot.slane %v4897_v21, %v4465_v58 }
  0xc5   :  { %3181 = vmatprep.subr.bf16.mxu0 %v4151_v26  ;;  %3217 = vmatpush1.bf16.msra.mxu1 %v4134_v52  ;;  %v1616_v54 = vsel %vm1473_vm4, %v1615_v62, %v1614_v45  ;;  %v607_v53 = vrot.slane %v4901_v42, %v4465_v58  ;;  %v671_v27 = vrot.slane %v4904_v24, %v4465_v58  ;;  %v4173_v62 = vld [vmem:[#allocation3 + $0x4c0] ss:$8 sps:$4 sm:$0xff]  }
  0xc6   :  { %3218 = vmatprep.subr.bf16.mxu1 %v4142_v30  ;;  %v1618_v26 = vsel %vm1476_vm5, %v1617_v31, %v1616_v54  ;;  %v821_v55 = vpack.c.bf16 %v223_v43, %v223_v43  ;;  %v837_v9 = vpack.c.bf16 %v287_v48, %v287_v48  ;;  %v853_v56 = vpack.c.bf16 %v351_v1, %v351_v1  ;;  %v4167_v30 = vld [vmem:[#allocation3 + $0x4d0] ss:$8 sps:$4 sm:$0xff]  }
  0xc7   :  { %v4926_v52 = vsel %vm1479_vm6, %v1619_v19, %v1618_v26  ;;  %v869_v13 = vpack.c.bf16 %v415_v49, %v415_v49  ;;  %v885_v29 = vpack.c.bf16 %v479_v50, %v479_v50  ;;  %v4931_v32 = vsel %vm1479_vm6, %v1591_v34, %v1590_v59 }
  0xc8   :  { %3182 = vmatpush1.bf16.msra.mxu0 %v4149_v12  ;;  %v901_v60 = vpack.c.bf16 %v543_v51, %v543_v51  ;;  %v917_v58 = vpack.c.bf16 %v607_v53, %v607_v53  ;;  %v933_v7 = vpack.c.bf16 %v671_v27, %v671_v27  ;;  %v4175_v12 = vld [vmem:[#allocation3 + $0x4c4] ss:$8 sps:$4 sm:$0xff]   ;;  %v1345_v36 = vunpack.c.l.b16 %v821_v55 }
  0xc9   :  { %3183 = vmatprep.subr.bf16.mxu0 %v4157_v39  ;;  %3219 = vmatpush1.bf16.msra.mxu1 %v4140_v22  ;;  %v1361_v38 = vunpack.c.l.b16 %v837_v9  ;;  %v1377_v17 = vunpack.c.l.b16 %v853_v56  ;;  %v1393_v22 = vunpack.c.l.b16 %v869_v13  ;;  %v4158_v39 = vld [vmem:[#allocation3 + $0x5f0] ss:$8 sps:$4 sm:$0xff]   ;;  %v1409_v10 = vunpack.c.l.b16 %v885_v29 }
  0xca   :  { %3220 = vmatprep.subr.bf16.mxu1 %v4148_v63  ;;  %v1425_v11 = vunpack.c.l.b16 %v901_v60  ;;  %v1441_v14 = vunpack.c.l.b16 %v917_v58  ;;  %v1457_v61 = vunpack.c.l.b16 %v933_v7  ;;  %v231_v41 = vrot.slane %v4855_v57, %v4497_v4  ;;  %v4187_v60 = vld [vmem:[#allocation3 + $0x4a4] ss:$8 sps:$4 sm:$0xff]  }
  0xcb   :  { %v1649_v15 = vrot.slane %v1361_v38, 7  ;;  %v1651_v34 = vrot.slane %v1377_v17, 6  ;;  %v1653_v59 = vrot.slane %v1393_v22, 5  ;;  %v1655_v63 = vrot.slane %v1409_v10, 4 }
  0xcc   :  { %3184 = vmatpush2.bf16.msra.mxu0 %v4155_v20  ;;  %v1657_v18 = vrot.slane %v1425_v11, 3  ;;  %v1659_v31 = vrot.slane %v1441_v14, 2  ;;  %v1661_v19 = vrot.slane %v1457_v61, 1  ;;  %v4181_v20 = vld [vmem:[#allocation3 + $0x4b4] ss:$8 sps:$4 sm:$0xff]   ;;  %v359_v23 = vrot.slane %v4887_v40, %v4497_v4 }
  0xcd   :  { %3185 = vmatprep.subr.bf16.mxu0 %v4163_v3  ;;  %3221 = vmatpush1.bf16.msra.mxu1 %v4146_v44  ;;  %v1650_v35 = vsel %vm1461_vm0, %v1649_v15, %v1345_v36  ;;  %v295_v3 = vrot.slane %v4881_v33, %v4497_v4  ;;  %v423_v43 = vrot.slane %v4891_v47, %v4497_v4  ;;  %v4164_v44 = vld [vmem:[#allocation3 + $0x5e0] ss:$8 sps:$4 sm:$0xff]   ;;  %v4170_v36 = vld [vmem:[#allocation3 + $0x5d0] ss:$8 sps:$4 sm:$0xff]  }
  0xce   :  { %3222 = vmatprep.subr.bf16.mxu1 %v4154_v37  ;;  %v1652_v45 = vsel %vm1464_vm1, %v1651_v34, %v1650_v35  ;;  %v487_v48 = vrot.slane %v4894_v2, %v4497_v4  ;;  %v551_v1 = vrot.slane %v4897_v21, %v4497_v4  ;;  %v615_v49 = vrot.slane %v4901_v42, %v4497_v4  ;;  %v4172_v37 = vld [vmem:[#allocation3 + $0x5d4] ss:$8 sps:$4 sm:$0xff]  }
  0xcf   :  { %v1654_v54 = vsel %vm1467_vm2, %v1653_v59, %v1652_v45  ;;  %v679_v50 = vrot.slane %v4904_v24, %v4497_v4  ;;  %v823_v51 = vpack.c.bf16 %v231_v41, %v231_v41  ;;  %v839_v53 = vpack.c.bf16 %v295_v3, %v295_v3 }
  0xd0   :  { %3186 = vmatpush2.bf16.msra.mxu0 %v4161_v25  ;;  %v1656_v25 = vsel %vm1470_vm3, %v1655_v63, %v1654_v54  ;;  %v855_v26 = vpack.c.bf16 %v359_v23, %v359_v23  ;;  %v871_v27 = vpack.c.bf16 %v423_v43, %v423_v43  ;;  %v887_v55 = vpack.c.bf16 %v487_v48, %v487_v48 }
  0xd1   :  { %3187 = vmatprep.subr.bf16.mxu0 %v4169_v28  ;;  %3223 = vmatpush1.bf16.msra.mxu1 %v4152_v8  ;;  %v4179_v8 = vld [vmem:[#allocation3 + $0x4b0] ss:$8 sps:$4 sm:$0xff]   ;;  %v1658_v9 = vsel %vm1473_vm4, %v1657_v18, %v1656_v25  ;;  %v903_v28 = vpack.c.bf16 %v551_v1, %v551_v1  ;;  %v919_v56 = vpack.c.bf16 %v615_v49, %v615_v49  ;;  %v1363_v4 = vunpack.c.l.b16 %v839_v53 }
  0xd2   :  { %3224 = vmatprep.subr.bf16.mxu1 %v4160_v6  ;;  %v935_v13 = vpack.c.bf16 %v679_v50, %v679_v50  ;;  %v1660_v29 = vsel %vm1476_vm5, %v1659_v31, %v1658_v9  ;;  %v1347_v6 = vunpack.c.l.b16 %v823_v51  ;;  %v1395_v58 = vunpack.c.l.b16 %v871_v27  ;;  %v4182_v9 = vld [vmem:[#allocation3 + $0x5b0] ss:$8 sps:$4 sm:$0xff]  }
  0xd3   :  { %v1411_v7 = vunpack.c.l.b16 %v887_v55  ;;  %v1699_v38 = vpack.c.b16 %v4931_v32, %v4931_v32  ;;  %v1443_v17 = vunpack.c.l.b16 %v919_v56  ;;  %v1677_v22 = vrot.slane %v1363_v4, 7  ;;  %v4217_v32 = vld [vmem:[#allocation3 + $0x654] ss:$8 sps:$4 sm:$0xff]  }
  0xd4   :  { %3188 = vmatpush2.bf16.msra.mxu0 %v4167_v30  ;;  %v1379_v30 = vunpack.c.l.b16 %v855_v26  ;;  %v4958_v10 = vsel %vm1479_vm6, %v1661_v19, %v1660_v29  ;;  %v1681_v14 = vrot.slane %v1395_v58, 5  ;;  %v4960_v15 = vunpack.c.l.b16 %v935_v13 }
  0xd5   :  { %3189 = vmatprep.subr.bf16.mxu0 %v4175_v12  ;;  %3225 = vmatpush2.bf16.msra.mxu1 %v4158_v39  ;;  %v1427_v12 = vunpack.c.l.b16 %v903_v28  ;;  %v4178_v39 = vld [vmem:[#allocation3 + $0x5c4] ss:$8 sps:$4 sm:$0xff]   ;;  %v1683_v61 = vrot.slane %v1411_v7, 4  ;;  %v1678_v34 = vsel %vm1461_vm0, %v1677_v22, %v1347_v6  ;;  %v1687_v41 = vrot.slane %v1443_v17, 2  ;;  %v4197_v7 = vld [vmem:[#allocation3 + $0x480] ss:$8 sps:$4 sm:$0xff]  }
  0xd6   :  { %3226 = vmatprep.subr.bf16.mxu1 %v4166_v16  ;;  %v1679_v11 = vrot.slane %v1379_v30, 6  ;;  %v4185_v16 = vld [vmem:[#allocation3 + $0x4a0] ss:$8 sps:$4 sm:$0xff]   ;;  %v219_v18 = vrot.slane %v4855_v57, %v4485_v0  ;;  %v283_v31 = vrot.slane %v4881_v33, %v4485_v0  ;;  %v347_v19 = vrot.slane %v4887_v40, %v4485_v0  ;;  %v4190_v6 = vld [vmem:[#allocation3 + $0x5a4] ss:$8 sps:$4 sm:$0xff]  }
  0xd7   :  { %v1685_v59 = vrot.slane %v1427_v12, 3  ;;  %v411_v3 = vrot.slane %v4891_v47, %v4485_v0  ;;  %v475_v23 = vrot.slane %v4894_v2, %v4485_v0  ;;  %v539_v43 = vrot.slane %v4897_v21, %v4485_v0 }
  0xd8   :  { %3190 = vmatpush2.bf16.msra.mxu0 %v4173_v62  ;;  %v4193_v62 = vld [vmem:[#allocation3 + $0x494] ss:$8 sps:$4 sm:$0xff]   ;;  %v1680_v63 = vsel %vm1464_vm1, %v1679_v11, %v1678_v34  ;;  %v603_v48 = vrot.slane %v4901_v42, %v4485_v0  ;;  %v667_v1 = vrot.slane %v4904_v24, %v4485_v0  ;;  %v820_v49 = vpack.c.bf16 %v219_v18, %v219_v18  ;;  %v4188_v34 = vld [vmem:[#allocation3 + $0x5a0] ss:$8 sps:$4 sm:$0xff]  }
  0xd9   :  { %3191 = vmatprep.subr.bf16.mxu0 %v4181_v20  ;;  %3227 = vmatpush2.bf16.msra.mxu1 %v4164_v44  ;;  %v4176_v20 = vld [vmem:[#allocation3 + $0x5c0] ss:$8 sps:$4 sm:$0xff]   ;;  %v1682_v35 = vsel %vm1467_vm2, %v1681_v14, %v1680_v63  ;;  %v4184_v44 = vld [vmem:[#allocation3 + $0x5b4] ss:$8 sps:$4 sm:$0xff]   ;;  %v836_v50 = vpack.c.bf16 %v283_v31, %v283_v31  ;;  %v852_v51 = vpack.c.bf16 %v347_v19, %v347_v19  ;;  %v1689_v28 = vrot.slane %v4960_v15, 1 }
  0xda   :  { %3228 = vmatprep.subr.bf16.mxu1 %v4172_v37  ;;  %v1684_v45 = vsel %vm1470_vm3, %v1683_v61, %v1682_v35  ;;  %v4191_v37 = vld [vmem:[#allocation3 + $0x490] ss:$8 sps:$4 sm:$0xff]   ;;  %v868_v53 = vpack.c.bf16 %v411_v3, %v411_v3  ;;  %v1704_v25 = vpack.c.b16 %v4958_v10, %v4958_v10  ;;  %v884_v26 = vpack.c.bf16 %v475_v23, %v475_v23  ;;  %v4196_v18 = vld [vmem:[#allocation3 + $0x594] ss:$8 sps:$4 sm:$0xff]  }
  0xdb   :  { %v1686_v54 = vsel %vm1473_vm4, %v1685_v59, %v1684_v45  ;;  %v900_v27 = vpack.c.bf16 %v539_v43, %v539_v43  ;;  %v916_v55 = vpack.c.bf16 %v603_v48, %v603_v48  ;;  %v932_v56 = vpack.c.bf16 %v667_v1, %v667_v1  ;;  %v4203_v35 = vld [vmem:[#allocation3 + $0x670] ss:$8 sps:$4 sm:$0xff]   ;;  %v4208_v10 = vld [vmem:[#allocation3 + $0x774] ss:$8 sps:$4 sm:$0xff]  }
  0xdc   :  { %3192 = vmatpush2.bf16.msra.mxu0 %v4179_v8  ;;  %v4199_v8 = vld [vmem:[#allocation3 + $0x484] ss:$8 sps:$4 sm:$0xff]   ;;  %v1344_v13 = vunpack.c.l.b16 %v820_v49  ;;  %v1360_v29 = vunpack.c.l.b16 %v836_v50  ;;  %v4987_v4 = vsel %vm1476_vm5, %v1687_v41, %v1686_v54  ;;  %v1376_v30 = vunpack.c.l.b16 %v852_v51  ;;  %v4194_v1 = vld [vmem:[#allocation3 + $0x590] ss:$8 sps:$4 sm:$0xff]  }
  0xdd   :  { %3193 = vmatprep.subr.bf16.mxu0 %v4187_v60  ;;  %3229 = vmatpush2.bf16.msra.mxu1 %v4170_v36  ;;  %v1392_v60 = vunpack.c.l.b16 %v868_v53  ;;  %v1408_v58 = vunpack.c.l.b16 %v884_v26  ;;  %v1424_v12 = vunpack.c.l.b16 %v900_v27  ;;  %v1440_v36 = vunpack.c.l.b16 %v916_v55 }
  0xde   :  { %3230 = vmatprep.subr.bf16.mxu1 %v4178_v39  ;;  %v1456_v17 = vunpack.c.l.b16 %v932_v56  ;;  %v1635_v22 = vrot.slane %v1360_v29, 7  ;;  %v4205_v39 = vld [vmem:[#allocation3 + $0x674] ss:$8 sps:$4 sm:$0xff]   ;;  %v1637_v11 = vrot.slane %v1376_v30, 6  ;;  %v291_v19 = vrot.slane %v4881_v33, %v4500_v5  ;;  %v4211_v33 = vld [vmem:[#allocation3 + $0x664] ss:$8 sps:$4 sm:$0xff]  }
  0xdf   :  { %v1639_v14 = vrot.slane %v1392_v60, 5  ;;  %v1641_v61 = vrot.slane %v1408_v58, 4  ;;  %v1643_v41 = vrot.slane %v1424_v12, 3  ;;  %v483_v23 = vrot.slane %v4894_v2, %v4500_v5  ;;  %v4200_v56 = vld [vmem:[#allocation3 + $0x580] ss:$8 sps:$4 sm:$0xff]  }
  0xe0   :  { %3194 = vmatpush2.bf16.msra.mxu0 %v4185_v16  ;;  %v227_v16 = vrot.slane %v4855_v57, %v4500_v5  ;;  %v1636_v59 = vsel %vm1461_vm0, %v1635_v22, %v1344_v13  ;;  %v1647_v63 = vrot.slane %v1456_v17, 1  ;;  %v419_v57 = vrot.slane %v4891_v47, %v4500_v5  ;;  %v4223_v22 = vld [vmem:[#allocation3 + $0x644] ss:$8 sps:$4 sm:$0xff]  }
  0xe1   :  { %3195 = vmatprep.subr.bf16.mxu0 %v4193_v62  ;;  %3231 = vmatpush2.bf16.msra.mxu1 %v4176_v20  ;;  %v1645_v62 = vrot.slane %v1440_v36, 2  ;;  %v1638_v31 = vsel %vm1464_vm1, %v1637_v11, %v1636_v59  ;;  %v355_v20 = vrot.slane %v4887_v40, %v4500_v5  ;;  %v547_v43 = vrot.slane %v4897_v21, %v4500_v5  ;;  %v4202_v21 = vld [vmem:[#allocation3 + $0x584] ss:$8 sps:$4 sm:$0xff]  }
  0xe2   :  { %3232 = vmatprep.subr.bf16.mxu1 %v4184_v44  ;;  %v1640_v3 = vsel %vm1467_vm2, %v1639_v14, %v1638_v31  ;;  %v611_v44 = vrot.slane %v4901_v42, %v4500_v5  ;;  %v675_v47 = vrot.slane %v4904_v24, %v4500_v5  ;;  %v822_v45 = vpack.c.bf16 %v227_v16, %v227_v16  ;;  %v4209_v24 = vld [vmem:[#allocation3 + $0x660] ss:$8 sps:$4 sm:$0xff]   ;;  %v4206_v14 = vld [vmem:[#allocation3 + $0x770] ss:$8 sps:$4 sm:$0xff]  }
  0xe3   :  { %v1642_v40 = vsel %vm1470_vm3, %v1641_v61, %v1640_v3  ;;  %v838_v48 = vpack.c.bf16 %v291_v19, %v291_v19  ;;  %v854_v2 = vpack.c.bf16 %v355_v20, %v355_v20  ;;  %v886_v54 = vpack.c.bf16 %v483_v23, %v483_v23  ;;  %v4214_v61 = vld [vmem:[#allocation3 + $0x764] ss:$8 sps:$4 sm:$0xff]   ;;  %v4227_v31 = vld [vmem:[#allocation3 + $0x630] ss:$8 sps:$4 sm:$0xff]   ;;  %v4241_v3 = vld [vmem:[#allocation3 + $0x614] ss:$8 sps:$4 sm:$0xff]  }
  0xe4   :  { %3196 = vmatpush2.bf16.msra.mxu0 %v4191_v37  ;;  %v1644_v49 = vsel %vm1473_vm4, %v1643_v41, %v1642_v40  ;;  %v870_v37 = vpack.c.bf16 %v419_v57, %v419_v57  ;;  %v902_v50 = vpack.c.bf16 %v547_v43, %v547_v43  ;;  %v918_v51 = vpack.c.bf16 %v611_v44, %v611_v44  ;;  %v4235_v19 = vld [vmem:[#allocation3 + $0x624] ss:$8 sps:$4 sm:$0xff]   ;;  %v4218_v20 = vld [vmem:[#allocation3 + $0x750] ss:$8 sps:$4 sm:$0xff]   ;;  %v4224_v23 = vld [vmem:[#allocation3 + $0x740] ss:$8 sps:$4 sm:$0xff]  }
  0xe5   :  { %3197 = vmatprep.subr.bf16.mxu0 %v4199_v8  ;;  %3233 = vmatpush2.bf16.msra.mxu1 %v4182_v9  ;;  %v1646_v42 = vsel %vm1476_vm5, %v1645_v62, %v1644_v49  ;;  %v1346_v5 = vunpack.c.l.b16 %v822_v45  ;;  %v934_v8 = vpack.c.bf16 %v675_v47, %v675_v47  ;;  %v1362_v26 = vunpack.c.l.b16 %v838_v48  ;;  %v4212_v62 = vld [vmem:[#allocation3 + $0x760] ss:$8 sps:$4 sm:$0xff]   ;;  %v4226_v57 = vld [vmem:[#allocation3 + $0x744] ss:$8 sps:$4 sm:$0xff]   ;;  %v4232_v43 = vld [vmem:[#allocation3 + $0x734] ss:$8 sps:$4 sm:$0xff]  }
  0xe6   :  { %3234 = vmatprep.subr.bf16.mxu1 %v4190_v6  ;;  %v5018_v53 = vsel %vm1479_vm6, %v1647_v63, %v1646_v42  ;;  %v1378_v27 = vunpack.c.l.b16 %v854_v2  ;;  %v1410_v55 = vunpack.c.l.b16 %v886_v54  ;;  %v1426_v9 = vunpack.c.l.b16 %v902_v50  ;;  %v4239_v44 = vld [vmem:[#allocation3 + $0x610] ss:$8 sps:$4 sm:$0xff]   ;;  %v4238_v47 = vld [vmem:[#allocation3 + $0x724] ss:$8 sps:$4 sm:$0xff]   ;;  %v4245_v45 = vld [vmem:[#allocation3 + $0x600] ss:$8 sps:$4 sm:$0xff]  }
  0xe7   :  { %v1442_v13 = vunpack.c.l.b16 %v918_v51  ;;  %v1458_v29 = vunpack.c.l.b16 %v934_v8  ;;  %v1663_v6 = vrot.slane %v1362_v26, 7  ;;  %v1701_v17 = vpack.c.b16 %v4926_v52, %v4926_v52  ;;  %v4229_v52 = vld [vmem:[#allocation3 + $0x634] ss:$8 sps:$4 sm:$0xff]   ;;  %v4230_v40 = vld [vmem:[#allocation3 + $0x730] ss:$8 sps:$4 sm:$0xff]  }
  0xe8   :  { %3198 = vmatpush2.bf16.msra.mxu0 %v4197_v7  ;;  %v1665_v30 = vrot.slane %v1378_v27, 6  ;;  %v1669_v58 = vrot.slane %v1410_v55, 4  ;;  %v4215_v7 = vld [vmem:[#allocation3 + $0x650] ss:$8 sps:$4 sm:$0xff]   ;;  %v1671_v36 = vrot.slane %v1426_v9, 3 }
  0xe9   :  { %3249 = vmatprep.subr.bf16.mxu0 %v4205_v39  ;;  %3235 = vmatpush2.bf16.msra.mxu1 %v4188_v34  ;;  %v1664_v12 = vsel %vm1461_vm0, %v1663_v6, %v1346_v5  ;;  %v1673_v11 = vrot.slane %v1442_v13, 2  ;;  %v4221_v34 = vld [vmem:[#allocation3 + $0x640] ss:$8 sps:$4 sm:$0xff]   ;;  %v4253_v48 = vld [vmem:[#allocation3 + $0x6f4] ss:$8 sps:$4 sm:$0xff]  }
  0xea   :  { %3236 = vmatprep.subr.bf16.mxu1 %v4196_v18  ;;  %v1666_v39 = vsel %vm1464_vm1, %v1665_v30, %v1664_v12  ;;  %v4220_v18 = vld [vmem:[#allocation3 + $0x754] ss:$8 sps:$4 sm:$0xff]   ;;  %v4251_v2 = vld [vmem:[#allocation3 + $0x6f0] ss:$8 sps:$4 sm:$0xff]   ;;  %v4257_v42 = vld [vmem:[#allocation3 + $0x6e0] ss:$8 sps:$4 sm:$0xff]  }
  0xeb   :  { %3200 = vmatmul.mubr.bf16.vlgmr.msra.gmra.mxu0 %v1699_v38  ;;  %v1394_v38 = vunpack.c.l.b16 %v870_v37  ;;  %v4244_v49 = vld [vmem:[#allocation3 + $0x714] ss:$8 sps:$4 sm:$0xff]   ;;  %v4259_v37 = vld [vmem:[#allocation3 + $0x6e4] ss:$8 sps:$4 sm:$0xff]   ;;  %v4242_v54 = vld [vmem:[#allocation3 + $0x710] ss:$8 sps:$4 sm:$0xff]  }
  0xec   :  { %3250 = vmatpush1.bf16.msra.mxu0 %v4203_v35  ;;  %3281 = vmatprep.mubr.bf16.mxu0 %v1704_v25  ;;  %v1690_v25 = vsel %vm1479_vm6, %v1689_v28, %v4987_v4  ;;  %v1675_v4 = vrot.slane %v1458_v29, 1  ;;  %v4233_v35 = vld [vmem:[#allocation3 + $0x620] ss:$8 sps:$4 sm:$0xff]   ;;  %v4265_v50 = vld [vmem:[#allocation3 + $0x6d4] ss:$8 sps:$4 sm:$0xff]  }
  0xed   :  { %3251 = vmatprep.subr.bf16.mxu0 %v4211_v33  ;;  %3237 = vmatpush2.bf16.msra.mxu1 %v4194_v1  ;;  %v1667_v60 = vrot.slane %v1394_v38, 5  ;;  %v1706_v15 = vpack.c.b16 %v1690_v25, %v1690_v25  ;;  %v4247_v33 = vld [vmem:[#allocation3 + $0x604] ss:$8 sps:$4 sm:$0xff]   ;;  %v4236_v1 = vld [vmem:[#allocation3 + $0x720] ss:$8 sps:$4 sm:$0xff]  }
  0xee   :  { %3238 = vmatprep.subr.bf16.mxu1 %v4202_v21  ;;  %v4250_v21 = vld [vmem:[#allocation3 + $0x704] ss:$8 sps:$4 sm:$0xff]   ;;  %v4248_v51 = vld [vmem:[#allocation3 + $0x700] ss:$8 sps:$4 sm:$0xff]   ;;  %v4256_v5 = vld [vmem:[#allocation3 + $0x7f4] ss:$8 sps:$4 sm:$0xff]  }
  0xef   :  { %v1668_v28 = vsel %vm1467_vm2, %v1667_v60, %v1666_v39  ;;  %v4271_v8 = vld [vmem:[#allocation3 + $0x6c4] ss:$8 sps:$4 sm:$0xff]   ;;  %v4254_v26 = vld [vmem:[#allocation3 + $0x7f0] ss:$8 sps:$4 sm:$0xff]   ;;  %v4277_v38 = vld [vmem:[#allocation3 + $0x6b4] ss:$8 sps:$4 sm:$0xff]  }
  0xf0   :  { %3252 = vmatpush1.bf16.msra.mxu0 %v4209_v24  ;;  %v1670_v16 = vsel %vm1470_vm3, %v1669_v58, %v1668_v28  ;;  %v4263_v24 = vld [vmem:[#allocation3 + $0x6d0] ss:$8 sps:$4 sm:$0xff]   ;;  %v4262_v27 = vld [vmem:[#allocation3 + $0x7e4] ss:$8 sps:$4 sm:$0xff]   ;;  %v4260_v55 = vld [vmem:[#allocation3 + $0x7e0] ss:$8 sps:$4 sm:$0xff]  }
  0xf1   :  { %3253 = vmatprep.subr.bf16.mxu0 %v4217_v32  ;;  %3239 = vmatpush2.bf16.msra.mxu1 %v4200_v56  ;;  %v1672_v59 = vsel %vm1473_vm4, %v1671_v36, %v1670_v16  ;;  %v4269_v32 = vld [vmem:[#allocation3 + $0x6c0] ss:$8 sps:$4 sm:$0xff]   ;;  %v4268_v9 = vld [vmem:[#allocation3 + $0x7d4] ss:$8 sps:$4 sm:$0xff]   ;;  %v4275_v56 = vld [vmem:[#allocation3 + $0x6b0] ss:$8 sps:$4 sm:$0xff]  }
  0xf2   :  { %3290 = vmatprep.subr.bf16.mxu1 %v4208_v10  ;;  %v1674_v41 = vsel %vm1476_vm5, %v1673_v11, %v1672_v59  ;;  %v4283_v13 = vld [vmem:[#allocation3 + $0x6a4] ss:$8 sps:$4 sm:$0xff]   ;;  %v4266_v29 = vld [vmem:[#allocation3 + $0x7d0] ss:$8 sps:$4 sm:$0xff]   ;;  %v4281_v30 = vld [vmem:[#allocation3 + $0x6a0] ss:$8 sps:$4 sm:$0xff]   ;;  %v1703_v11 = vpack.c.b16 %v5018_v53, %v5018_v53 }
  0xf3   :  { %v5033_v63 = vsel %vm1479_vm6, %v1675_v4, %v1674_v41  ;;  %v4274_v6 = vld [vmem:[#allocation3 + $0x7c4] ss:$8 sps:$4 sm:$0xff]   ;;  %v4289_v10 = vld [vmem:[#allocation3 + $0x694] ss:$8 sps:$4 sm:$0xff]   ;;  %v4272_v25 = vld [vmem:[#allocation3 + $0x7c0] ss:$8 sps:$4 sm:$0xff]  }
  0xf4   :  { %3254 = vmatpush1.bf16.msra.mxu0 %v4215_v7  ;;  %3241 = vmatmul.mubr.bf16.vlgmr.msra.gmra.mxu1 %v1701_v17  ;;  %v4280_v60 = vld [vmem:[#allocation3 + $0x7b4] ss:$8 sps:$4 sm:$0xff]   ;;  %v4287_v58 = vld [vmem:[#allocation3 + $0x690] ss:$8 sps:$4 sm:$0xff]   ;;  %v4295_v7 = vld [vmem:[#allocation3 + $0x684] ss:$8 sps:$4 sm:$0xff]   ;;  %v1705_v41 = vpack.c.b16 %v5033_v63, %v5033_v63 }
  0xf5   :  { %3255 = vmatprep.subr.bf16.mxu0 %v4223_v22  ;;  %3291 = vmatpush1.bf16.msra.mxu1 %v4206_v14  ;;  %v4278_v12 = vld [vmem:[#allocation3 + $0x7b0] ss:$8 sps:$4 sm:$0xff]   ;;  %v4286_v36 = vld [vmem:[#allocation3 + $0x7a4] ss:$8 sps:$4 sm:$0xff]   ;;  %v4293_v17 = vld [vmem:[#allocation3 + $0x680] ss:$8 sps:$4 sm:$0xff]  }
  0xf6   :  { %3322 = vmatprep.mubr.bf16.mxu1 %v1706_v15  ;;  %3292 = vmatprep.subr.bf16.mxu1 %v4214_v61  ;;  %v4284_v22 = vld [vmem:[#allocation3 + $0x7a0] ss:$8 sps:$4 sm:$0xff]   ;;  %v4292_v39 = vld [vmem:[#allocation3 + $0x794] ss:$8 sps:$4 sm:$0xff]   ;;  %v4290_v14 = vld [vmem:[#allocation3 + $0x790] ss:$8 sps:$4 sm:$0xff]  }
  0xf7   :  { %v4298_v15 = vld [vmem:[#allocation3 + $0x784] ss:$8 sps:$4 sm:$0xff]   ;;  %v1192_v28 = vld [vmem:[%s5062_s2] sm:$0x3]  ;;  %v5041_v61 = vsub.s32 1, %v4448_v46 }
  0xf8   :  { %3256 = vmatpush1.bf16.msra.mxu0 %v4221_v34  ;;  %v4296_v34 = vld [vmem:[#allocation3 + $0x780] ss:$8 sps:$4 sm:$0xff]   ;;  %v1197_v59 = vrot.slane %v1192_v28, %v4485_v0  ;;  %v4305_v63 = vld [vmem:[#allocation5 + $0x50] ss:$8 sps:$4 sm:$0xff]  }
  0xf9   :  { %3257 = vmatprep.subr.bf16.mxu0 %v4229_v52  ;;  %3293 = vmatpush1.bf16.msra.mxu1 %v4212_v62  ;;  %v1201_v52 = vrot.slane %v1192_v28, %v5041_v61 }
  0xfa   :  { %3294 = vmatprep.subr.bf16.mxu1 %v4220_v18 }
  0xfc   :  { %3258 = vmatpush1.bf16.msra.mxu0 %v4227_v31 }
  0xfd   :  { %3259 = vmatprep.subr.bf16.mxu0 %v4235_v19  ;;  %3295 = vmatpush1.bf16.msra.mxu1 %v4218_v20 }
  0xfe   :  { %3296 = vmatprep.subr.bf16.mxu1 %v4226_v57 }
 0x100   :  { %3260 = vmatpush1.bf16.msra.mxu0 %v4233_v35 }
 0x101   :  { %3261 = vmatprep.subr.bf16.mxu0 %v4241_v3  ;;  %3297 = vmatpush1.bf16.msra.mxu1 %v4224_v23  ;;  %v4299_v23 = vld [vmem:[#allocation5 + $0x70] ss:$8 sps:$4 sm:$0xff]  }
 0x102   :  { %3298 = vmatprep.subr.bf16.mxu1 %v4232_v43  ;;  %v4301_v43 = vld [vmem:[#allocation5 + $0x74] ss:$8 sps:$4 sm:$0xff]  }
 0x104   :  { %3262 = vmatpush1.bf16.msra.mxu0 %v4239_v44  ;;  %v4304_v44 = vld [vmem:[#allocation5 + $0x64] ss:$8 sps:$4 sm:$0xff]  }
 0x105   :  { %3263 = vmatprep.subr.bf16.mxu0 %v4247_v33  ;;  %3299 = vmatpush1.bf16.msra.mxu1 %v4230_v40  ;;  %v4302_v33 = vld [vmem:[#allocation5 + $0x60] ss:$8 sps:$4 sm:$0xff]   ;;  %v4307_v40 = vld [vmem:[#allocation5 + $0x54] ss:$8 sps:$4 sm:$0xff]  }
 0x106   :  { %3300 = vmatprep.subr.bf16.mxu1 %v4238_v47  ;;  %v4310_v47 = vld [vmem:[#allocation5 + $0x44] ss:$8 sps:$4 sm:$0xff]  }
 0x108   :  { %3264 = vmatpush1.bf16.msra.mxu0 %v4245_v45  ;;  %v4308_v45 = vld [vmem:[#allocation5 + $0x40] ss:$8 sps:$4 sm:$0xff]  }
 0x109   :  { %3265 = vmatprep.subr.bf16.mxu0 %v4253_v48  ;;  %3301 = vmatpush1.bf16.msra.mxu1 %v4236_v1  ;;  %v4313_v48 = vld [vmem:[#allocation5 + $0x34] ss:$8 sps:$4 sm:$0xff]   ;;  %v4311_v1 = vld [vmem:[#allocation5 + $0x30] ss:$8 sps:$4 sm:$0xff]  }
 0x10a   :  { %3302 = vmatprep.subr.bf16.mxu1 %v4244_v49  ;;  %v4316_v49 = vld [vmem:[#allocation5 + $0x24] ss:$8 sps:$4 sm:$0xff]  }
 0x10c   :  { %3266 = vmatpush2.bf16.msra.mxu0 %v4251_v2  ;;  %v4314_v2 = vld [vmem:[#allocation5 + $0x20] ss:$8 sps:$4 sm:$0xff]  }
 0x10d   :  { %3267 = vmatprep.subr.bf16.mxu0 %v4259_v37  ;;  %3303 = vmatpush1.bf16.msra.mxu1 %v4242_v54  ;;  %v4319_v37 = vld [vmem:[#allocation5 + $0x14] ss:$8 sps:$4 sm:$0xff]   ;;  %v4317_v54 = vld [vmem:[#allocation5 + $0x10] ss:$8 sps:$4 sm:$0xff]  }
 0x10e   :  { %3304 = vmatprep.subr.bf16.mxu1 %v4250_v21  ;;  %v4322_v21 = vld [vmem:[#allocation5 + $0x4] ss:$8 sps:$4 sm:$0xff]  }
 0x110   :  { %3268 = vmatpush2.bf16.msra.mxu0 %v4257_v42  ;;  %v4320_v42 = vld [vmem:[#allocation5] ss:$8 sps:$4 sm:$0xff]  }
 0x111   :  { %3269 = vmatprep.subr.bf16.mxu0 %v4265_v50  ;;  %3305 = vmatpush1.bf16.msra.mxu1 %v4248_v51  ;;  %v4325_v50 = vld [vmem:[#allocation5 + $0xf4] ss:$8 sps:$4 sm:$0xff]   ;;  %v4323_v51 = vld [vmem:[#allocation5 + $0xf0] ss:$8 sps:$4 sm:$0xff]  }
 0x112   :  { %3306 = vmatprep.subr.bf16.mxu1 %v4256_v5  ;;  %v4328_v5 = vld [vmem:[#allocation5 + $0xe4] ss:$8 sps:$4 sm:$0xff]  }
 0x114   :  { %3270 = vmatpush2.bf16.msra.mxu0 %v4263_v24  ;;  %v4326_v24 = vld [vmem:[#allocation5 + $0xe0] ss:$8 sps:$4 sm:$0xff]  }
 0x115   :  { %3271 = vmatprep.subr.bf16.mxu0 %v4271_v8  ;;  %3307 = vmatpush2.bf16.msra.mxu1 %v4254_v26  ;;  %v4331_v8 = vld [vmem:[#allocation5 + $0xd4] ss:$8 sps:$4 sm:$0xff]   ;;  %v4329_v26 = vld [vmem:[#allocation5 + $0xd0] ss:$8 sps:$4 sm:$0xff]  }
 0x116   :  { %3308 = vmatprep.subr.bf16.mxu1 %v4262_v27  ;;  %v4334_v27 = vld [vmem:[#allocation5 + $0xc4] ss:$8 sps:$4 sm:$0xff]  }
 0x118   :  { %3272 = vmatpush2.bf16.msra.mxu0 %v4269_v32  ;;  %v4332_v32 = vld [vmem:[#allocation5 + $0xc0] ss:$8 sps:$4 sm:$0xff]  }
 0x119   :  { %3273 = vmatprep.subr.bf16.mxu0 %v4277_v38  ;;  %3309 = vmatpush2.bf16.msra.mxu1 %v4260_v55  ;;  %v4337_v38 = vld [vmem:[#allocation5 + $0xb4] ss:$8 sps:$4 sm:$0xff]   ;;  %v4335_v55 = vld [vmem:[#allocation5 + $0xb0] ss:$8 sps:$4 sm:$0xff]  }
 0x11a   :  { %3310 = vmatprep.subr.bf16.mxu1 %v4268_v9 }
 0x11c   :  { %3274 = vmatpush2.bf16.msra.mxu0 %v4275_v56 }
 0x11d   :  { %3275 = vmatprep.subr.bf16.mxu0 %v4283_v13  ;;  %3311 = vmatpush2.bf16.msra.mxu1 %v4266_v29 }
 0x11e   :  { %3312 = vmatprep.subr.bf16.mxu1 %v4274_v6 }
 0x120   :  { %3276 = vmatpush2.bf16.msra.mxu0 %v4281_v30 }
 0x121   :  { %3277 = vmatprep.subr.bf16.mxu0 %v4289_v10  ;;  %3313 = vmatpush2.bf16.msra.mxu1 %v4272_v25  ;;  %v4340_v10 = vld [vmem:[#allocation5 + $0xa4] ss:$8 sps:$4 sm:$0xff]   ;;  %v4338_v25 = vld [vmem:[#allocation5 + $0xa0] ss:$8 sps:$4 sm:$0xff]  }
 0x122   :  { %3314 = vmatprep.subr.bf16.mxu1 %v4280_v60 }
 0x124   :  { %3278 = vmatpush2.bf16.msra.mxu0 %v4287_v58 }
 0x125   :  { %3279 = vmatprep.subr.bf16.mxu0 %v4295_v7  ;;  %3315 = vmatpush2.bf16.msra.mxu1 %v4278_v12  ;;  %v4343_v12 = vld [vmem:[#allocation5 + $0x94] ss:$8 sps:$4 sm:$0xff]  }
 0x126   :  { %3316 = vmatprep.subr.bf16.mxu1 %v4286_v36 }
 0x128   :  { %3280 = vmatpush2.bf16.msra.mxu0 %v4293_v17  ;;  %v4341_v17 = vld [vmem:[#allocation5 + $0x90] ss:$8 sps:$4 sm:$0xff]  }
 0x129   :  { %3317 = vmatpush2.bf16.msra.mxu1 %v4284_v22  ;;  %3539 = vmatprep.subr.bf16.mxu0 %v4301_v43 }
 0x12a   :  { %3318 = vmatprep.subr.bf16.mxu1 %v4292_v39 }
 0x12b   :  { %v3037_v4 = vpop.f32.mrf.mxu0  ;;  %3282 = vmatmul.mubr.bf16.vlgmr.msra.gmra.mxu0 %v1703_v11  ;;  %v4346_v11 = vld [vmem:[#allocation5 + $0x84] ss:$8 sps:$4 sm:$0xff]  }
 0x12c   :  { %v3038_v18 = vadd.f32 %v3037_v4, %v1197_v59  ;;  %3540 = vmatpush1.bf16.msra.mxu0 %v4299_v23 }
 0x12d   :  { %v3039_v16 = vpop.f32.mrf.mxu0  ;;  %3319 = vmatpush2.bf16.msra.mxu1 %v4290_v14  ;;  %3541 = vmatprep.subr.bf16.mxu0 %v4304_v44  ;;  %v4344_v14 = vld [vmem:[#allocation5 + $0x80] ss:$8 sps:$4 sm:$0xff]  }
 0x12e   :  { %3320 = vmatprep.subr.bf16.mxu1 %v4298_v15  ;;  %v3040_v31 = vadd.f32 %v3039_v16, %v1201_v52 }
 0x12f   :  { %v3041_v53 = vpop.f32.mrf.mxu0 }
 0x130   :  { %3542 = vmatpush1.bf16.msra.mxu0 %v4302_v33 }
 0x131   :  { %v3042_v62 = vpop.f32.mrf.mxu0  ;;  %3321 = vmatpush2.bf16.msra.mxu1 %v4296_v34  ;;  %3543 = vmatprep.subr.bf16.mxu0 %v4307_v40 }
 0x133   :  { %v3078_v19 = vpop.f32.mrf.mxu1 }
 0x134   :  { %3323 = vmatmul.mubr.bf16.vlgmr.msra.gmra.mxu1 %v1705_v41  ;;  %v3079_v46 = vadd.f32 %v3078_v19, %v3038_v18  ;;  %3544 = vmatpush1.bf16.msra.mxu0 %v4305_v63 }
 0x135   :  { %v3080_v20 = vpop.f32.mrf.mxu1  ;;  %3545 = vmatprep.subr.bf16.mxu0 %v4310_v47 }
 0x136   :  { %v3081_v57 = vadd.f32 %v3080_v20, %v3040_v31 }
 0x137   :  { %v3082_v35 = vpop.f32.mrf.mxu1 }
 0x138   :  { %3546 = vmatpush1.bf16.msra.mxu0 %v4308_v45 }
 0x139   :  { %v3083_v3 = vpop.f32.mrf.mxu1  ;;  %3547 = vmatprep.subr.bf16.mxu0 %v4313_v48 }
 0x13c   :  { %3548 = vmatpush1.bf16.msra.mxu0 %v4311_v1 }
 0x13d   :  { %3549 = vmatprep.subr.bf16.mxu0 %v4316_v49  ;;  %v3367_v49 = vld [vmem:[%s5064_s4] sm:$0x3] }
 0x140   :  { %3550 = vmatpush1.bf16.msra.mxu0 %v4314_v2  ;;  %v3372_v2 = vrot.slane %v3367_v49, %v4485_v0 }
 0x141   :  { %3551 = vmatprep.subr.bf16.mxu0 %v4319_v37  ;;  %v3376_v37 = vrot.slane %v3367_v49, %v5041_v61 }
 0x144   :  { %3552 = vmatpush1.bf16.msra.mxu0 %v4317_v54 }
 0x145   :  { %3553 = vmatprep.subr.bf16.mxu0 %v4322_v21  ;;  %v3582_v21 = vld [vmem:[%s5065_s5] sm:$0x3] }
 0x148   :  { %3554 = vmatpush1.bf16.msra.mxu0 %v4320_v42 }
 0x149   :  { %3555 = vmatprep.subr.bf16.mxu0 %v4325_v50 }
 0x14c   :  { %3556 = vmatpush2.bf16.msra.mxu0 %v4323_v51 }
 0x14d   :  { %3557 = vmatprep.subr.bf16.mxu0 %v4328_v5 }
 0x150   :  { %3558 = vmatpush2.bf16.msra.mxu0 %v4326_v24  ;;  %v3587_v24 = vrot.slane %v3582_v21, %v4485_v0 }
 0x151   :  { %3559 = vmatprep.subr.bf16.mxu0 %v4331_v8  ;;  %v3591_v8 = vrot.slane %v3582_v21, %v5041_v61 }
 0x154   :  { %3560 = vmatpush2.bf16.msra.mxu0 %v4329_v26 }
 0x155   :  { %3561 = vmatprep.subr.bf16.mxu0 %v4334_v27 }
 0x158   :  { %3562 = vmatpush2.bf16.msra.mxu0 %v4332_v32 }
 0x159   :  { %3563 = vmatprep.subr.bf16.mxu0 %v4337_v38 }
 0x15c   :  { %3564 = vmatpush2.bf16.msra.mxu0 %v4335_v55 }
 0x15d   :  { %3565 = vmatprep.subr.bf16.mxu0 %v4340_v10 }
 0x160   :  { %3566 = vmatpush2.bf16.msra.mxu0 %v4338_v25 }
 0x161   :  { %3567 = vmatprep.subr.bf16.mxu0 %v4343_v12 }
 0x164   :  { %3568 = vmatpush2.bf16.msra.mxu0 %v4341_v17 }
 0x165   :  { %3569 = vmatprep.subr.bf16.mxu0 %v4346_v11 }
 0x168   :  { %3570 = vmatpush2.bf16.msra.mxu0 %v4344_v14 }
 0x16b   :  { %v3119_v9 = vpop.f32.mrf.mxu0 }
 0x16c   :  { %v3120_v56 = vadd.f32 %v3119_v9, %v3079_v46 }
 0x16d   :  { %v3121_v13 = vpop.f32.mrf.mxu0 }
 0x16e   :  { %v3122_v29 = vadd.f32 %v3121_v13, %v3081_v57 }
 0x16f   :  { %v3123_v6 = vpop.f32.mrf.mxu0 }
 0x171   :  { %v3124_v30 = vpop.f32.mrf.mxu0 }
 0x174   :  { %v3160_v60 = vpop.f32.mrf.mxu1 }
 0x175   :  { %v3161_v58 = vadd.f32 %v3160_v60, %v3120_v56  ;;  %v3910_v56 = vld [vmem:[#allocation2] ss:$0 sm:$0xff] }
 0x176   :  { %v3162_v7 = vpop.f32.mrf.mxu1 }
 0x177   :  { %v3163_v36 = vadd.f32 %v3162_v7, %v3122_v29 }
 0x178   :  { %v3164_v22 = vpop.f32.mrf.mxu1 }
 0x17a   :  { %v3165_v39 = vpop.f32.mrf.mxu1 }
 0x1ab   :  { %v3201_v15 = vpop.f32.mrf.mxu0 }
 0x1ac   :  { %v3202_v28 = vadd.f32 %v3201_v15, %v3161_v58 }
 0x1ad   :  { %v3203_v4 = vpop.f32.mrf.mxu0 }
 0x1ae   :  { %v3204_v16 = vadd.f32 %v3203_v4, %v3163_v36 }
 0x1af   :  { %v3205_v34 = vpop.f32.mrf.mxu0 }
 0x1b1   :  { %v3206_v59 = vpop.f32.mrf.mxu0 }
 0x1b4   :  { %v3242_v53 = vpop.f32.mrf.mxu1 }
 0x1b5   :  { %v3243_v46 = vadd.f32 %v3242_v53, %v3202_v28 }
 0x1b6   :  { %v3244_v52 = vpop.f32.mrf.mxu1 }
 0x1b7   :  { %v3245_v57 = vadd.f32 %v3244_v52, %v3204_v16 }
 0x1b8   :  { %v3246_v41 = vpop.f32.mrf.mxu1 }
 0x1ba   :  { %v3247_v62 = vpop.f32.mrf.mxu1 }
 0x1eb   :  { %v3283_v18 = vpop.f32.mrf.mxu0 }
 0x1ec   :  { %v3284_v35 = vadd.f32 %v3283_v18, %v3243_v46 }
 0x1ed   :  { %v3285_v31 = vpop.f32.mrf.mxu0 }
 0x1ee   :  { %v3286_v3 = vadd.f32 %v3285_v31, %v3245_v57 }
 0x1ef   :  { %v3287_v19 = vpop.f32.mrf.mxu0 }
 0x1f1   :  { %v3288_v20 = vpop.f32.mrf.mxu0 }
 0x1f4   :  { %v3324_v23 = vpop.f32.mrf.mxu1 }
 0x1f5   :  { %v3325_v43 = vadd.f32 %v3324_v23, %v3284_v35 }
 0x1f6   :  { %v3326_v44 = vpop.f32.mrf.mxu1 }
 0x1f7   :  { %v3327_v33 = vadd.f32 %v3326_v44, %v3286_v3  ;;  %v3331_v40 = vmax.f32 %v3325_v43, 0.0 }
 0x1f8   :  { %v3328_v63 = vpop.f32.mrf.mxu1 }
 0x1f9   :  { %v3332_v47 = vmax.f32 %v3327_v33, 0.0  ;;  %v3333_v1 = vpack.c.bf16 %v3331_v40, %v3331_v40 }
 0x1fa   :  { %v3329_v45 = vpop.f32.mrf.mxu1 }
 0x1fb   :  { %v3334_v48 = vpack.c.bf16 %v3332_v47, %v3332_v47 }
 0x1fd   :  { %3571 = vmatprep.mubr.bf16.mxu0 %v3334_v48 }
 0x1fe   :  { %3572 = vmatmul.mubr.bf16.vlgmr.msra.gmra.mxu0 %v3333_v1 }
 0x2be   :  { %v3573_v54 = vpop.f32.mrf.mxu0 }
 0x2bf   :  { %v3574_v42 = vadd.f32 %v3573_v54, %v3372_v2 }
 0x2c0   :  { %v3575_v50 = vpop.f32.mrf.mxu0 }
 0x2c1   :  { %v3580_v51 = vmax.f32 %v3574_v42, 0.0  ;;  %v3576_v5 = vadd.f32 %v3575_v50, %v3376_v37 }
 0x2c2   :  { %v3577_v26 = vpop.f32.mrf.mxu0 }
 0x2c3   :  { %v3581_v27 = vmax.f32 %v3576_v5, 0.0  ;;  %v3594_v38 = vmul.f32 %v3587_v24, %v3580_v51 }
 0x2c4   :  { %v3578_v32 = vpop.f32.mrf.mxu0 }
 0x2c5   :  { %v3595_v55 = vmul.f32 %v3591_v8, %v3581_v27 }
 0x2c7   :  { %v3596_v9 = vadd.f32 %v3595_v55, %v3594_v38 }
 0x2c9   :  { %3597 = vadd.xlane.f32.xlu0 %v3596_v9 }
 0x352   :  { %v3598_v13 = vpop.xlane.xlu0 %3597 }
 0x353   :  { %v3606_v29 = vadd.f32 %v3910_v56, %v3598_v13 }
 0x355   :  { %v3607_v6 = vsub.f32 0.0, %v3606_v29 }
 0x357   :  { %v3608_v30 = vmul.f32 1.442695, %v3607_v6 }
 0x359   :  { %4347 = vpow2.f32 %v3608_v30 }
 0x366   :  { %v4348_v10 = vpop.eup %4347 }
 0x367   :  { %v3610_v25 = vadd.f32 1.0, %v4348_v10 }
 0x369   :  { %4349 = vrcp.f32 %v3610_v25 }
 0x376   :  { %v4350_v60 = vpop.eup %4349 }
 0x377   :  { %v3612_v0 = vmax.f32 %v4350_v60, 0.0 }
 0x379   :  { %v3613_v61 = vmin.f32 %v3612_v0, 1.0 }
 0x37b   :  { %3615 = vst.msk [vmem:[%s5067_s7] sm:$0xff] %vm3614_vm7, %v3613_v61 }
 0x37c   :  { %3620 = vsyncpa [#allocation4], 1 }
 0x37d   :  { %3621 = vsyncpa [#allocation6], 1 }

</bundles_post_ra>
